<compile_context>
chip_gen: v5e
topology: v5e:2x2
jax: 0.10.0
libtpu: 0.0.40
codegen_flags: <defaults>
</compile_context>

<pallas_src>
import functools

import jax
import jax.numpy as jnp
from jax.experimental import pallas as pl
from jax.experimental.pallas import tpu as pltpu


def _round_up(x, m):
    return ((x + m - 1) // m) * m


def _nwd_kernel(tiles_per_split, scal_ref, f_ref, w_ref, b_ref, gs_ref, gt_ref):
    split = pl.program_id(0)       # "parallel" axis (v7x TC sharding when used)
    step = pl.program_id(1)        # "arbitrary" reduction axis over batch tiles

    # Output blocks have a constant block index along the step axis, so they
    # stay resident in VMEM across the reduction: zero them on the first step.
    @pl.when(step == 0)
    def _():
        gs_ref[...] = jnp.zeros_like(gs_ref)
        gt_ref[...] = jnp.zeros_like(gt_ref)

    tn = f_ref.shape[0]
    tile_idx = split * tiles_per_split + step
    tile_start = tile_idx * tn
    tile_end = tile_start + tn

    num_s = scal_ref[0]            # number of source rows (prefix of f)
    n_valid = scal_ref[1]          # true N (rows >= n_valid are invalid/garbage)

    # Skip all compute on fully padded grid steps (their DMA re-reads the last
    # valid block but nothing is accumulated).
    @pl.when(tile_start < n_valid)
    def _():
        # Linear classifier: bf16 operands, f32 MXU accumulation; bias in f32.
        logits = jnp.dot(f_ref[...], w_ref[...],
                         preferred_element_type=jnp.float32) + b_ref[...]

        # Numerically stable row softmax over the lane-padded class axis.
        # Padded classes carry bias -1e30, so exp() underflows to exactly 0 and
        # the denominator matches the unpadded softmax.  Softmax stays in f32.
        logits = logits - jnp.max(logits, axis=1, keepdims=True)
        e = jnp.exp(logits)
        # Denominator >= 1 after max subtraction -> approx reciprocal on the
        # EUP is safe (error ~1e-4 rel, buried under the bf16 Gram cast below).
        pre = e * pl.reciprocal(jnp.sum(e, axis=1, keepdims=True), approx=True)

        dims = (((0,), (0,)), ((), ()))                  # contract over rows

        all_src = tile_end <= num_s
        all_tgt = jnp.logical_and(tile_start >= num_s, tile_end <= n_valid)

        @pl.when(all_src)
        def _():
            p = pre.astype(jnp.bfloat16)                 # bf16 into the MXU
            gs_ref[...] += jax.lax.dot_general(
                p, p, dims, preferred_element_type=jnp.float32)

        @pl.when(all_tgt)
        def _():
            p = pre.astype(jnp.bfloat16)
            gt_ref[...] += jax.lax.dot_general(
                p, p, dims, preferred_element_type=jnp.float32)

        @pl.when(jnp.logical_not(jnp.logical_or(all_src, all_tgt)))
        def _():
            # Boundary tile (source/target split and/or ragged batch tail):
            # mask rows with a cheap (tn, 1) iota.  Source and target rows are
            # disjoint, so  Gram(valid) = Gram(src) + Gram(tgt)  exactly and we
            # recover Gt by subtraction (saves one select per boundary step).
            # Rows >= n_valid may contain undefined overhang data; masking them
            # to exact zeros means they contribute nothing to either Gram.
            row = tile_start + jax.lax.broadcasted_iota(jnp.int32, (tn, 1), 0)
            pre_v = jnp.where(row < n_valid, pre, 0.0).astype(jnp.bfloat16)
            pre_s = jnp.where(row < num_s, pre, 0.0).astype(jnp.bfloat16)
            g_v = jax.lax.dot_general(pre_v, pre_v, dims,
                                      preferred_element_type=jnp.float32)
            g_s = jax.lax.dot_general(pre_s, pre_s, dims,
                                      preferred_element_type=jnp.float32)
            gs_ref[...] += g_s
            gt_ref[...] += g_v - g_s


def _vmem_budget_bytes(tile_n, d, c_pad):
    """Rough VMEM budget for one grid step (double-buffered pipeline)."""
    f_bytes = 2 * tile_n * d * 2            # double-buffered bf16 f tile
    w_bytes = 2 * d * c_pad * 2             # bf16 weights (2 pipeline buffers)
    b_bytes = 2 * c_pad * 4
    acc_bytes = 2 * 2 * c_pad * c_pad * 4   # gs/gt resident output blocks
    tmp_bytes = 4 * tile_n * c_pad * 4      # logits / exp / pre / masked-pre f32
    return f_bytes + w_bytes + b_bytes + acc_bytes + tmp_bytes


def nuclear_wasserstein_discrepancy(f, w, b, num_s, *, tile_n=512,
                                    num_splits=1, core_parallel=False):
    """f: [N, D], w: [D, C] (= Linear.weight.T), b: [1, C], num_s: python int.

    tile_n: batch-tile size; sweep 512-2048 for production shapes (the kernel
        is HBM-bound, bigger tiles amortize per-step pipeline overhead).
    num_splits / core_parallel: set (2, True) on v7x to shard the batch across
        the two TensorCores; keep (1, False) on v5e/v6e (single TC).
    """
    N, D = f.shape
    C = w.shape[1]
    assert 0 < num_s < N, "need both source and target rows"

    c_pad = _round_up(C, 128)                       # lane-dense class axis
    tile_n = max(8, min(_round_up(tile_n, 8), _round_up(N, 8)))
    n_tiles = pl.cdiv(N, tile_n)
    tiles_per_split = pl.cdiv(n_tiles, num_splits)
    last_blk = n_tiles - 1

    # No materialized zero-padded copy of f: a bandwidth-bound kernel cannot
    # afford an extra full write+read of f in HBM.  Only cast if needed.
    f_bf = f if f.dtype == jnp.bfloat16 else f.astype(jnp.bfloat16)

    # Padded classes MUST get a large-negative bias (not 0) so softmax of the
    # padding is exactly zero (bias/logits/softmax stay in f32).
    if C == c_pad:
        w_p = w.astype(jnp.bfloat16)
        b_p = b.reshape(1, C).astype(jnp.float32)
    else:
        w_p = jnp.zeros((D, c_pad), jnp.bfloat16).at[:, :C].set(
            w.astype(jnp.bfloat16))
        b_p = jnp.full((1, c_pad), -1e30, jnp.float32).at[:, :C].set(
            b.reshape(1, C).astype(jnp.float32))

    scal = jnp.array([num_s, N], dtype=jnp.int32)
    kernel = functools.partial(_nwd_kernel, tiles_per_split)

    # Explicit VMEM budget: only raise the scoped limit when the tile needs it
    # (v5e default 16 MiB, v6e/v7x 32 MiB); cap at v7x's 64 MiB physical.
    budget = _vmem_budget_bytes(tile_n, D, c_pad)
    vmem_limit = None
    if budget > (16 << 20):
        vmem_limit = min(int(budget * 3 // 2), 64 << 20)

    if core_parallel:
        dim_sem = (pltpu.CORE_PARALLEL, pltpu.ARBITRARY)   # v7x: 2 TCs
    else:
        dim_sem = ("parallel", "arbitrary")

    def f_map(s, i, ns):
        # Clamp so padded grid steps never start a fully out-of-bounds DMA
        # (their compute is skipped in-kernel anyway).
        return (jnp.minimum(s * tiles_per_split + i, last_blk), 0)

    gs_parts, gt_parts = pl.pallas_call(
        kernel,
        out_shape=(
            jax.ShapeDtypeStruct((num_splits, c_pad, c_pad), jnp.float32),
            jax.ShapeDtypeStruct((num_splits, c_pad, c_pad), jnp.float32),
        ),
        grid_spec=pltpu.PrefetchScalarGridSpec(
            num_scalar_prefetch=1,
            grid=(num_splits, tiles_per_split),
            in_specs=[
                # f: streamed batch tiles (auto double-buffered pipeline).
                pl.BlockSpec((tile_n, D), f_map),
                # w, b: resident for the whole grid (constant index map).
                pl.BlockSpec((D, c_pad), lambda s, i, ns: (0, 0)),
                pl.BlockSpec((1, c_pad), lambda s, i, ns: (0, 0)),
            ],
            out_specs=(
                pl.BlockSpec((None, c_pad, c_pad), lambda s, i, ns: (s, 0, 0)),
                pl.BlockSpec((None, c_pad, c_pad), lambda s, i, ns: (s, 0, 0)),
            ),
        ),
        compiler_params=pltpu.CompilerParams(
            dimension_semantics=dim_sem,
            vmem_limit_bytes=vmem_limit),
    )(scal, f_bf, w_p, b_p)

    gs = jnp.sum(gs_parts, axis=0)
    gt = jnp.sum(gt_parts, axis=0)

    # TODO(synk): nuclear norm via eigendecomposition of the tiny Gram matrix
    # (no Pallas-native SVD); zero padded rows/cols only add zero eigenvalues.
    def nuc_from_gram(g):
        ev = jnp.linalg.eigvalsh(g)
        return jnp.sum(jnp.sqrt(jnp.clip(ev, 0.0, None)))

    n_t = N - num_s
    return -nuc_from_gram(gt) / n_t + nuc_from_gram(gs) / num_s


def _reference(f, w, b, num_s):
    """Pure-JAX reference mirroring the PyTorch module (GRL = identity fwd)."""
    y = f @ w + b
    y_s, y_t = y[:num_s], y[num_s:]
    pre_s = jax.nn.softmax(y_s, axis=1)
    pre_t = jax.nn.softmax(y_t, axis=1)
    nuc = lambda m: jnp.sum(jnp.linalg.svd(m, compute_uv=False))
    return -nuc(pre_t) / y_t.shape[0] + nuc(pre_s) / y_s.shape[0]


if __name__ == "__main__":
    # Small deterministic shapes: N=384 rows (num_s=160 source), D=128, C=8.
    # With tile_n=128 and num_splits=1 this exercises an all-source tile, a
    # mixed boundary tile and an all-target tile.  (Production shapes should
    # use the default tile_n=512+.)
    N, D, C = 384, 128, 8
    num_s = 160

    key = jax.random.PRNGKey(0)
    k_f, k_w, k_b = jax.random.split(key, 3)
    f = jax.random.normal(k_f, (N, D), dtype=jnp.float32)
    w = jax.random.normal(k_w, (D, C), dtype=jnp.float32) * 0.1   # Linear(D,C)
    b = jax.random.normal(k_b, (1, C), dtype=jnp.float32) * 0.1

    loss = jax.block_until_ready(
        nuclear_wasserstein_discrepancy(f, w, b, num_s, tile_n=128))

    # Reference uses the same bf16-quantized f / w the kernel consumes.  The
    # kernel additionally uses bf16 Gram operands and an approx reciprocal in
    # the softmax, so the tolerance is a few e-4 absolute on a ~1e-2 loss.
    f_q = f.astype(jnp.bfloat16).astype(jnp.float32)
    w_q = w.astype(jnp.bfloat16).astype(jnp.float32)
    ref = jax.block_until_ready(_reference(f_q, w_q, b, num_s))

    assert jnp.allclose(loss, ref, atol=2e-3, rtol=2e-2), (loss, ref)
    print("KERNEL_OK")
</pallas_src>

<mosaic_0001>
module attributes {stable_mosaic.version = 11 : i64} {
  func.func @_nwd_kernel(%arg0: i32, %arg1: i32, %arg2: memref<2xi32, #tpu.memory_space<smem>>, %arg3: memref<128x128xbf16, #tpu.memory_space<vmem>>, %arg4: memref<128x128xbf16, #tpu.memory_space<vmem>>, %arg5: memref<1x128xf32, #tpu.memory_space<vmem>>, %arg6: memref<1x128x128xf32, #tpu.memory_space<vmem>>, %arg7: memref<1x128x128xf32, #tpu.memory_space<vmem>>) attributes {dimension_semantics = [#tpu.dimension_semantics<parallel>, #tpu.dimension_semantics<arbitrary>], iteration_bounds = array<i64: 1, 3>, scalar_prefetch = 1 : i64, scratch_operands = 0 : i64, tpu.core_type = #tpu.core_type<tc>, window_params = [{transform_indices = @transform_0, window_bounds = array<i64: 128, 128>}, {pipeline_mode = #tpu.pipeline_mode<synchronous>, transform_indices = @transform_1, window_bounds = array<i64: 128, 128>}, {pipeline_mode = #tpu.pipeline_mode<synchronous>, transform_indices = @transform_2, window_bounds = array<i64: 1, 128>}, {transform_indices = @transform_3, window_bounds = array<i64: 1, 128, 128>}, {transform_indices = @transform_4, window_bounds = array<i64: 1, 128, 128>}]} {
    %c0_i32 = arith.constant 0 : i32
    %0 = arith.cmpi eq, %arg1, %c0_i32 : i32
    %1 = arith.extui %0 : i1 to i32
    %c0_i32_0 = arith.constant 0 : i32
    %2 = arith.cmpi ne, %1, %c0_i32_0 : i32
    scf.if %2 {
      %cst = arith.constant 0.000000e+00 : f32
      %12 = vector.broadcast %cst : f32 to vector<128x128xf32>
      %c0_3 = arith.constant 0 : index
      %c0_4 = arith.constant 0 : index
      %c0_5 = arith.constant 0 : index
      %13 = vector.load %arg6[%c0_3, %c0_4, %c0_5] : memref<1x128x128xf32, #tpu.memory_space<vmem>>, vector<1x128x128xf32>
      %14 = vector.shape_cast %13 : vector<1x128x128xf32> to vector<128x128xf32>
      %15 = vector.shape_cast %12 : vector<128x128xf32> to vector<1x128x128xf32>
      tpu.vector_store %arg6[%c0_3, %c0_4, %c0_5], %15 {strides = array<i32>} : memref<1x128x128xf32, #tpu.memory_space<vmem>>, vector<1x128x128xf32>,
      %cst_6 = arith.constant 0.000000e+00 : f32
      %16 = vector.broadcast %cst_6 : f32 to vector<128x128xf32>
      %c0_7 = arith.constant 0 : index
      %c0_8 = arith.constant 0 : index
      %c0_9 = arith.constant 0 : index
      %17 = vector.load %arg7[%c0_7, %c0_8, %c0_9] : memref<1x128x128xf32, #tpu.memory_space<vmem>>, vector<1x128x128xf32>
      %18 = vector.shape_cast %17 : vector<1x128x128xf32> to vector<128x128xf32>
      %19 = vector.shape_cast %16 : vector<128x128xf32> to vector<1x128x128xf32>
      tpu.vector_store %arg7[%c0_7, %c0_8, %c0_9], %19 {strides = array<i32>} : memref<1x128x128xf32, #tpu.memory_space<vmem>>, vector<1x128x128xf32>,
    } else {
    }
    %c3_i32 = arith.constant 3 : i32
    %3 = arith.muli %arg0, %c3_i32 : i32
    %4 = arith.addi %3, %arg1 : i32
    %c128_i32 = arith.constant 128 : i32
    %5 = arith.muli %4, %c128_i32 : i32
    %c128_i32_1 = arith.constant 128 : i32
    %6 = arith.addi %5, %c128_i32_1 : i32
    %c0 = arith.constant 0 : index
    %7 = memref.load %arg2[%c0] : memref<2xi32, #tpu.memory_space<smem>>
    %c1 = arith.constant 1 : index
    %8 = memref.load %arg2[%c1] : memref<2xi32, #tpu.memory_space<smem>>
    %9 = arith.cmpi slt, %5, %8 : i32
    %10 = arith.extui %9 : i1 to i32
    %c0_i32_2 = arith.constant 0 : i32
    %11 = arith.cmpi ne, %10, %c0_i32_2 : i32
    scf.if %11 {
      %c0_3 = arith.constant 0 : index
      %c0_4 = arith.constant 0 : index
      %12 = vector.load %arg3[%c0_3, %c0_4] : memref<128x128xbf16, #tpu.memory_space<vmem>>, vector<128x128xbf16>
      %c0_5 = arith.constant 0 : index
      %c0_6 = arith.constant 0 : index
      %13 = vector.load %arg4[%c0_5, %c0_6] : memref<128x128xbf16, #tpu.memory_space<vmem>>, vector<128x128xbf16>
      %cst = arith.constant dense<0.000000e+00> : vector<128x128xf32>
      %14 = tpu.matmul %12, %13, %cst {dimension_numbers = #tpu.dot_dimension_numbers<[1], [0], [0], [1], [0, 0, 1, 1], [], []>} : vector<128x128xbf16>, vector<128x128xbf16>, vector<128x128xf32> -> vector<128x128xf32>
      %c0_7 = arith.constant 0 : index
      %c0_8 = arith.constant 0 : index
      %15 = vector.load %arg5[%c0_7, %c0_8] : memref<1x128xf32, #tpu.memory_space<vmem>>, vector<1x128xf32>
      %16 = vector.broadcast %15 : vector<1x128xf32> to vector<128x128xf32>
      %17 = arith.addf %14, %16 : vector<128x128xf32>
      %cst_9 = arith.constant dense<0xFF800000> : vector<128xf32>
      %18 = vector.multi_reduction <maximumf>, %17, %cst_9 [1] : vector<128x128xf32> to vector<128xf32>
      %19 = vector.shape_cast %18 : vector<128xf32> to vector<128x1xf32>
      %20 = vector.broadcast %19 : vector<128x1xf32> to vector<128x128xf32>
      %21 = arith.subf %17, %20 : vector<128x128xf32>
      %22 = math.exp %21 : vector<128x128xf32>
      %cst_10 = arith.constant dense<0.000000e+00> : vector<128xf32>
      %23 = vector.multi_reduction <add>, %22, %cst_10 [1] : vector<128x128xf32> to vector<128xf32>
      %24 = vector.shape_cast %23 : vector<128xf32> to vector<128x1xf32>
      %25 = tpu.reciprocal %24 {approx = true} : vector<128x1xf32> -> vector<128x1xf32>
      %26 = vector.broadcast %25 : vector<128x1xf32> to vector<128x128xf32>
      %27 = arith.mulf %22, %26 : vector<128x128xf32>
      %28 = arith.cmpi sle, %6, %7 : i32
      %29 = arith.cmpi sge, %5, %7 : i32
      %30 = arith.cmpi sle, %6, %8 : i32
      %31 = arith.andi %29, %30 : i1
      %32 = arith.extui %28 : i1 to i32
      %c0_i32_11 = arith.constant 0 : i32
      %33 = arith.cmpi ne, %32, %c0_i32_11 : i32
      scf.if %33 {
        %40 = arith.truncf %27 : vector<128x128xf32> to vector<128x128xbf16>
        %c0_14 = arith.constant 0 : index
        %c0_15 = arith.constant 0 : index
        %c0_16 = arith.constant 0 : index
        %41 = vector.load %arg6[%c0_14, %c0_15, %c0_16] : memref<1x128x128xf32, #tpu.memory_space<vmem>>, vector<1x128x128xf32>
        %42 = vector.shape_cast %41 : vector<1x128x128xf32> to vector<128x128xf32>
        %cst_17 = arith.constant dense<0.000000e+00> : vector<128x128xf32>
        %43 = tpu.matmul %40, %40, %cst_17 {dimension_numbers = #tpu.dot_dimension_numbers<[0], [0], [1], [1], [0, 1, 1, 1], [], []>} : vector<128x128xbf16>, vector<128x128xbf16>, vector<128x128xf32> -> vector<128x128xf32>
        %44 = arith.addf %42, %43 : vector<128x128xf32>
        %c0_18 = arith.constant 0 : index
        %c0_19 = arith.constant 0 : index
        %c0_20 = arith.constant 0 : index
        %45 = vector.load %arg6[%c0_18, %c0_19, %c0_20] : memref<1x128x128xf32, #tpu.memory_space<vmem>>, vector<1x128x128xf32>
        %46 = vector.shape_cast %45 : vector<1x128x128xf32> to vector<128x128xf32>
        %47 = vector.shape_cast %44 : vector<128x128xf32> to vector<1x128x128xf32>
        tpu.vector_store %arg6[%c0_18, %c0_19, %c0_20], %47 {strides = array<i32>} : memref<1x128x128xf32, #tpu.memory_space<vmem>>, vector<1x128x128xf32>,
      } else {
      }
      %34 = arith.extui %31 : i1 to i32
      %c0_i32_12 = arith.constant 0 : i32
      %35 = arith.cmpi ne, %34, %c0_i32_12 : i32
      scf.if %35 {
        %40 = arith.truncf %27 : vector<128x128xf32> to vector<128x128xbf16>
        %c0_14 = arith.constant 0 : index
        %c0_15 = arith.constant 0 : index
        %c0_16 = arith.constant 0 : index
        %41 = vector.load %arg7[%c0_14, %c0_15, %c0_16] : memref<1x128x128xf32, #tpu.memory_space<vmem>>, vector<1x128x128xf32>
        %42 = vector.shape_cast %41 : vector<1x128x128xf32> to vector<128x128xf32>
        %cst_17 = arith.constant dense<0.000000e+00> : vector<128x128xf32>
        %43 = tpu.matmul %40, %40, %cst_17 {dimension_numbers = #tpu.dot_dimension_numbers<[0], [0], [1], [1], [0, 1, 1, 1], [], []>} : vector<128x128xbf16>, vector<128x128xbf16>, vector<128x128xf32> -> vector<128x128xf32>
        %44 = arith.addf %42, %43 : vector<128x128xf32>
        %c0_18 = arith.constant 0 : index
        %c0_19 = arith.constant 0 : index
        %c0_20 = arith.constant 0 : index
        %45 = vector.load %arg7[%c0_18, %c0_19, %c0_20] : memref<1x128x128xf32, #tpu.memory_space<vmem>>, vector<1x128x128xf32>
        %46 = vector.shape_cast %45 : vector<1x128x128xf32> to vector<128x128xf32>
        %47 = vector.shape_cast %44 : vector<128x128xf32> to vector<1x128x128xf32>
        tpu.vector_store %arg7[%c0_18, %c0_19, %c0_20], %47 {strides = array<i32>} : memref<1x128x128xf32, #tpu.memory_space<vmem>>, vector<1x128x128xf32>,
      } else {
      }
      %36 = arith.ori %28, %31 : i1
      %true = arith.constant true
      %37 = arith.xori %36, %true : i1
      %38 = arith.extui %37 : i1 to i32
      %c0_i32_13 = arith.constant 0 : i32
      %39 = arith.cmpi ne, %38, %c0_i32_13 : i32
      scf.if %39 {
        %40 = tpu.iota {dimensions = array<i32: 0>} : vector<128x1xi32>
        %41 = vector.broadcast %5 : i32 to vector<128x1xi32>
        %42 = arith.addi %41, %40 : vector<128x1xi32>
        %43 = vector.broadcast %8 : i32 to vector<128x1xi32>
        %44 = arith.cmpi slt, %42, %43 : vector<128x1xi32>
        %cst_14 = arith.constant 0.000000e+00 : f32
        %45 = vector.shape_cast %44 : vector<128x1xi1> to vector<128x1xi1>
        %46 = vector.broadcast %45 : vector<128x1xi1> to vector<128x128xi1>
        %47 = vector.broadcast %cst_14 : f32 to vector<128x128xf32>
        %48 = arith.select %46, %27, %47 : vector<128x128xi1>, vector<128x128xf32>
        %49 = arith.truncf %48 : vector<128x128xf32> to vector<128x128xbf16>
        %50 = vector.broadcast %7 : i32 to vector<128x1xi32>
        %51 = arith.cmpi slt, %42, %50 : vector<128x1xi32>
        %cst_15 = arith.constant 0.000000e+00 : f32
        %52 = vector.shape_cast %51 : vector<128x1xi1> to vector<128x1xi1>
        %53 = vector.broadcast %52 : vector<128x1xi1> to vector<128x128xi1>
        %54 = vector.broadcast %cst_15 : f32 to vector<128x128xf32>
        %55 = arith.select %53, %27, %54 : vector<128x128xi1>, vector<128x128xf32>
        %56 = arith.truncf %55 : vector<128x128xf32> to vector<128x128xbf16>
        %cst_16 = arith.constant dense<0.000000e+00> : vector<128x128xf32>
        %57 = tpu.matmul %49, %49, %cst_16 {dimension_numbers = #tpu.dot_dimension_numbers<[0], [0], [1], [1], [0, 1, 1, 1], [], []>} : vector<128x128xbf16>, vector<128x128xbf16>, vector<128x128xf32> -> vector<128x128xf32>
        %cst_17 = arith.constant dense<0.000000e+00> : vector<128x128xf32>
        %58 = tpu.matmul %56, %56, %cst_17 {dimension_numbers = #tpu.dot_dimension_numbers<[0], [0], [1], [1], [0, 1, 1, 1], [], []>} : vector<128x128xbf16>, vector<128x128xbf16>, vector<128x128xf32> -> vector<128x128xf32>
        %c0_18 = arith.constant 0 : index
        %c0_19 = arith.constant 0 : index
        %c0_20 = arith.constant 0 : index
        %59 = vector.load %arg6[%c0_18, %c0_19, %c0_20] : memref<1x128x128xf32, #tpu.memory_space<vmem>>, vector<1x128x128xf32>
        %60 = vector.shape_cast %59 : vector<1x128x128xf32> to vector<128x128xf32>
        %61 = arith.addf %60, %58 : vector<128x128xf32>
        %c0_21 = arith.constant 0 : index
        %c0_22 = arith.constant 0 : index
        %c0_23 = arith.constant 0 : index
        %62 = vector.load %arg6[%c0_21, %c0_22, %c0_23] : memref<1x128x128xf32, #tpu.memory_space<vmem>>, vector<1x128x128xf32>
        %63 = vector.shape_cast %62 : vector<1x128x128xf32> to vector<128x128xf32>
        %64 = vector.shape_cast %61 : vector<128x128xf32> to vector<1x128x128xf32>
        tpu.vector_store %arg6[%c0_21, %c0_22, %c0_23], %64 {strides = array<i32>} : memref<1x128x128xf32, #tpu.memory_space<vmem>>, vector<1x128x128xf32>,
        %c0_24 = arith.constant 0 : index
        %c0_25 = arith.constant 0 : index
        %c0_26 = arith.constant 0 : index
        %65 = vector.load %arg7[%c0_24, %c0_25, %c0_26] : memref<1x128x128xf32, #tpu.memory_space<vmem>>, vector<1x128x128xf32>
        %66 = vector.shape_cast %65 : vector<1x128x128xf32> to vector<128x128xf32>
        %67 = arith.subf %57, %58 : vector<128x128xf32>
        %68 = arith.addf %66, %67 : vector<128x128xf32>
        %c0_27 = arith.constant 0 : index
        %c0_28 = arith.constant 0 : index
        %c0_29 = arith.constant 0 : index
        %69 = vector.load %arg7[%c0_27, %c0_28, %c0_29] : memref<1x128x128xf32, #tpu.memory_space<vmem>>, vector<1x128x128xf32>
        %70 = vector.shape_cast %69 : vector<1x128x128xf32> to vector<128x128xf32>
        %71 = vector.shape_cast %68 : vector<128x128xf32> to vector<1x128x128xf32>
        tpu.vector_store %arg7[%c0_27, %c0_28, %c0_29], %71 {strides = array<i32>} : memref<1x128x128xf32, #tpu.memory_space<vmem>>, vector<1x128x128xf32>,
      } else {
      }
    } else {
    }
    return
  }
  func.func @transform_0(%arg0: i32, %arg1: i32, %arg2: memref<2xi32, #tpu.memory_space<smem>>) -> (i32, i32) {
    %c3_i32 = arith.constant 3 : i32
    %0 = arith.muli %arg0, %c3_i32 : i32
    %1 = arith.addi %0, %arg1 : i32
    %c2_i32 = arith.constant 2 : i32
    %2 = arith.minsi %1, %c2_i32 : i32
    %c0_i32 = arith.constant 0 : i32
    %c0_i32_0 = arith.constant 0 : i32
    return %2, %c0_i32 : i32, i32
  }
  func.func @transform_1(%arg0: i32, %arg1: i32, %arg2: memref<2xi32, #tpu.memory_space<smem>>) -> (i32, i32) {
    %c0_i32 = arith.constant 0 : i32
    %c0_i32_0 = arith.constant 0 : i32
    %c0_i32_1 = arith.constant 0 : i32
    return %c0_i32, %c0_i32_0 : i32, i32
  }
  func.func @transform_2(%arg0: i32, %arg1: i32, %arg2: memref<2xi32, #tpu.memory_space<smem>>) -> (i32, i32) {
    %c0_i32 = arith.constant 0 : i32
    %c0_i32_0 = arith.constant 0 : i32
    %c0_i32_1 = arith.constant 0 : i32
    return %c0_i32, %c0_i32_0 : i32, i32
  }
  func.func @transform_3(%arg0: i32, %arg1: i32, %arg2: memref<2xi32, #tpu.memory_space<smem>>) -> (i32, i32, i32) {
    %c0_i32 = arith.constant 0 : i32
    %c0_i32_0 = arith.constant 0 : i32
    %c0_i32_1 = arith.constant 0 : i32
    return %arg0, %c0_i32, %c0_i32_0 : i32, i32, i32
  }
  func.func @transform_4(%arg0: i32, %arg1: i32, %arg2: memref<2xi32, #tpu.memory_space<smem>>) -> (i32, i32, i32) {
    %c0_i32 = arith.constant 0 : i32
    %c0_i32_0 = arith.constant 0 : i32
    %c0_i32_1 = arith.constant 0 : i32
    return %arg0, %c0_i32, %c0_i32_0 : i32, i32, i32
  }
}

</mosaic_0001>

<bundles_post_ra>
// kernel: tpu_custom_call.1
= control target key start
LH: loop header
LB: loop body
LE: loop exit
PB: predicated region body
PF: predicated region fallthrough
CT: control target
= control target key end

     0   :  { %s2042_s21 = smov [#allocation3]   ;;  %s2774_s0 = inlined_call_operand.hbm [shape: s32[2], index: 0, kind: input, shape index: {}]   ;;  %s2775_s1 = inlined_call_operand.hbm [shape: bf16[384,128], index: 1, kind: input, shape index: {}]   ;;  %s2776_s2 = inlined_call_operand.hbm [shape: bf16[128,128], index: 2, kind: input, shape index: {}]   ;;  %s2777_s3 = inlined_call_operand.vmem [shape: f32[1,128], index: 3, kind: input, shape index: {}]   ;;  %s2778_s4 = inlined_call_operand.hbm [shape: f32[1,128,128], index: 4, kind: output, shape index: {0}]   ;;  %s2779_s5 = inlined_call_operand.hbm [shape: f32[1,128,128], index: 5, kind: output, shape index: {1}]  }
   0x1   :  { %s12_s20 = sshll.u32 %s2774_s0, 4  ;;  %s13_s20 = int_to_ptr.hbm [resolvable:$true] %s12_s20 }
   0x2   :  { %15 = dma.hbm_to_smem %s13_s20, 16, %s2042_s21, [#allocation2] }
   0x3   :  { %2000 = dma.done.wait [#allocation2], 16 }
   0x4   :  { %2001 = vsyncadd [#allocation2], 4294967280 }
   0x5   :  { %18 = sfence }
   0x6   :  { %19 = vsyncpa [#allocation5], 0 }
   0x7   :  { %21 = vsyncpa [#allocation5 + $0x1], 0 }
   0x8   :  { %22 = vsyncpa [#allocation8], 0 }
   0x9   :  { %23 = vsyncpa [#allocation6], 0 }
   0xa   :  { %24 = vsyncpa [#allocation11], 0  ;;  %s2084_s22 = smov 0   ;;  %s2086_s23 = smov 0  }
   0xb   :  { %s2088_s24 = smov 0   ;;  %s2090_s25 = smov 0  }
   0xc   :  { %s2092_s0 = smov 0   ;;  %s2094_s26 = smov 0  }
   0xd LB: > { %s2780_s27 = sadd.s32 4294967295, %s2040_s26   ;;  %p70_p0 = scmp.ne.s32.totalorder %s2024_s23, %s2020_s22  ;;  %s2040_s26 = sphi %s2094_s26, %s30_s26   ;;  %s2036_s0 = sphi %s2092_s0, %s2831_s0   ;;  %s2032_s25 = sphi %s2090_s25, %s2830_s25   ;;  %s2028_s24 = sphi %s2088_s24, %s2829_s24   ;;  %s2024_s23 = sphi %s2086_s23, %s2828_s23   ;;  %s2020_s22 = sphi %s2084_s22, %s2827_s22  }
   0xe   : > { %p2116_p1 = scmp.eq.s32.totalorder %s2780_s27, 0  ;;  %p1436_p2 = scmp.ge.s32.totalorder %s2040_s26, 1 }
   0xf   : > { %p175_p3 = scmp.lt.s32.totalorder %s2040_s26, 4  ;;  %s186_s7 = sshll.u32 %s2776_s2, 4  ;;  %s187_s7 = int_to_ptr.hbm [resolvable:$true] %s186_s7 }
  0x10   : > { %p2124_p4 = por %p2116_p1, %p70_p0  ;;  %s2043_s9 = smov [#allocation7]  }
  0x11   : > { %p2131_p5 = pnand %p1436_p2, %p175_p3  ;;  %s188_s10 = sshll.u32 %s2043_s9, 4  ;;  %s189_s10 = int_to_ptr.vmem [resolvable:$true] %s188_s10 }
  0x12   : > { %s2044_s11 = smov 64   ;;  %s2045_s12 = smov 4  }
  0x13   : > { %p1687_p6 = pneg %p2131_p5  ;;  %s39_s13 = sadd.s32 1, %s2036_s0 }
  0x14   : > { %p40_p8 = scmp.ge.s32.totalorder %s39_s13, 3  ;;  %p48_p9 = scmp.lt.s32.totalorder %s2036_s0, 2 }
  0x15   : > { %p1688_p7 = pnand %p1687_p6, %p2116_p1  ;;  %s57_s14 = sadd.s32 1, %s2028_s24 }
  0x16   : > { %p64_p10 = scmp.ne.s32.totalorder %s2028_s24, %s2024_s23  ;;  %s2833_s13 = smov (%p40_p8, %s39_s13), 0 }
  0x17   : > { %1690 = dma.hbm_to_vmem [thread:$0]  (!%p1688_p7), %s187_s7, 1024, %s189_s10, [#allocation8], %s2044_s11, %s2044_s11, %s2045_s12  }
  0x18   : > { %s49_s15 = scalar_select %p48_p9, %s2036_s0, 2 }
  0x19   : > { %p52_p11 = scmp.lt.s32.totalorder %s2833_s13, 2  ;;  %p65_p12 = scmp.eq.s32.totalorder %s2040_s26, 0 }
  0x1a   : > { %p1696_p13 = scmp.lt.s32.totalorder %s2040_s26, 3  ;;  %s205_s16 = sand.u32 1, %s2028_s24  }
  0x1b   : > { %s53_s17 = scalar_select %p52_p11, %s2833_s13, 2 }
  0x1c   : > { %p66_p0 = por %p65_p12, %p64_p10  ;;  %s1439_s19 = sshll.u32 %s205_s16, 6 }
  0x1d   : > { %s54_s18 = ssub.s32 %s49_s15, %s53_s17  ;;  %s1568_s20 = sshll.u32 %s49_s15, 6 }
  0x1e   : > { %p55_p2 = scmp.eq.s32.totalorder %s54_s18, 0  ;;  %s209_s21 = scalar_lea.vmem [#allocation4], %s1439_s19 }
  0x1f   : > { %s221_s22 = sshll.u32 %s209_s21, 4  ;;  %s218_s9 = scalar_lea.hbm %s2775_s1, %s1568_s20  ;;  %s222_s22 = int_to_ptr.vmem [resolvable:$true] %s221_s22 }
  0x20   : > { %s2156_s30 = scalar_select %p55_p2, %s2028_s24, %s57_s14  }
  0x21   : > { %s219_s10 = sshll.u32 %s218_s9, 4  ;;  %p1692_p3 = pnand %p1696_p13, %p66_p0  ;;  %s220_s10 = int_to_ptr.hbm [resolvable:$true] %s219_s10 }
  0x22   : > { %s206_s27 = scalar_lea.sflag [#allocation5], %s205_s16  ;;  %233 = sbr.rel (%p2131_p5) target bundleno = 1889 (0x761), region = 32 }
  0x23   : > { %1694 = dma.hbm_to_vmem [thread:$0]  (!%p1692_p3), %s220_s10, 1024, %s222_s22, %s206_s27, %s2044_s11, %s2044_s11, %s2045_s12  }
  0x24   : > { %s235_s14 = sand.u32 (!%p2131_p5), 1, %s2024_s23  }
  0x25   : > { %s1443_s15 = sshll.u32 (!%p2131_p5), %s235_s14, 6  ;;  %s236_s17 = scalar_lea.sflag (!%p2131_p5), [#allocation5], %s235_s14 }
  0x26   : > { %s2169_s18 = scalar_lea.vmem (!%p2131_p5), [#allocation4], %s1443_s15 }
  0x27   : > { %2003 = dma.done.wait (%p2124_p4), %s236_s17, 1024  }
  0x28   : > { %2005 = vsyncadd (%p2124_p4), %s236_s17, 4294966272 }
  0x29   : > { %2007 = dma.done.wait (%p2116_p1), [#allocation8], 1024  }
  0x2a   : > { %2009 = vsyncadd (%p2116_p1), [#allocation8], 4294966272  ;;  %p1445_p5 = scmp.ne.s32.totalorder %s2032_s25, 0 }
  0x2c   : > { %273 = sbr.rel (%p1445_p5) target bundleno = 82 (0x52), region = 44 }
  0x31   : > { %v2046_v0 = vmov 0.0  }
  0x32   : > { %274 = vst [vmem:[#allocation9] sm:$0xff] %v2046_v0 }
  0x33   : > { %275 = vst [vmem:[#allocation9 + $0x8] sm:$0xff] %v2046_v0 }
  0x34   : > { %276 = vst [vmem:[#allocation9 + $0x10] sm:$0xff] %v2046_v0 }
  0x35   : > { %277 = vst [vmem:[#allocation9 + $0x18] sm:$0xff] %v2046_v0 }
  0x36   : > { %278 = vst [vmem:[#allocation9 + $0x20] sm:$0xff] %v2046_v0 }
  0x37   : > { %279 = vst [vmem:[#allocation9 + $0x28] sm:$0xff] %v2046_v0 }
  0x38   : > { %280 = vst [vmem:[#allocation9 + $0x30] sm:$0xff] %v2046_v0 }
  0x39   : > { %281 = vst [vmem:[#allocation9 + $0x38] sm:$0xff] %v2046_v0 }
  0x3a   : > { %282 = vst [vmem:[#allocation9 + $0x40] sm:$0xff] %v2046_v0 }
  0x3b   : > { %283 = vst [vmem:[#allocation9 + $0x48] sm:$0xff] %v2046_v0 }
  0x3c   : > { %284 = vst [vmem:[#allocation9 + $0x50] sm:$0xff] %v2046_v0 }
  0x3d   : > { %285 = vst [vmem:[#allocation9 + $0x58] sm:$0xff] %v2046_v0 }
  0x3e   : > { %286 = vst [vmem:[#allocation9 + $0x60] sm:$0xff] %v2046_v0 }
  0x3f   : > { %287 = vst [vmem:[#allocation9 + $0x68] sm:$0xff] %v2046_v0 }
  0x40   : > { %288 = vst [vmem:[#allocation9 + $0x70] sm:$0xff] %v2046_v0 }
  0x41   : > { %289 = vst [vmem:[#allocation9 + $0x78] sm:$0xff] %v2046_v0 }
  0x42   : > { %290 = vst [vmem:[#allocation10] sm:$0xff] %v2046_v0 }
  0x43   : > { %291 = vst [vmem:[#allocation10 + $0x8] sm:$0xff] %v2046_v0 }
  0x44   : > { %292 = vst [vmem:[#allocation10 + $0x10] sm:$0xff] %v2046_v0 }
  0x45   : > { %293 = vst [vmem:[#allocation10 + $0x18] sm:$0xff] %v2046_v0 }
  0x46   : > { %294 = vst [vmem:[#allocation10 + $0x20] sm:$0xff] %v2046_v0 }
  0x47   : > { %295 = vst [vmem:[#allocation10 + $0x28] sm:$0xff] %v2046_v0 }
  0x48   : > { %296 = vst [vmem:[#allocation10 + $0x30] sm:$0xff] %v2046_v0 }
  0x49   : > { %297 = vst [vmem:[#allocation10 + $0x38] sm:$0xff] %v2046_v0 }
  0x4a   : > { %298 = vst [vmem:[#allocation10 + $0x40] sm:$0xff] %v2046_v0 }
  0x4b   : > { %299 = vst [vmem:[#allocation10 + $0x48] sm:$0xff] %v2046_v0 }
  0x4c   : > { %300 = vst [vmem:[#allocation10 + $0x50] sm:$0xff] %v2046_v0 }
  0x4d   : > { %301 = vst [vmem:[#allocation10 + $0x58] sm:$0xff] %v2046_v0 }
  0x4e   : > { %302 = vst [vmem:[#allocation10 + $0x60] sm:$0xff] %v2046_v0 }
  0x4f   : > { %303 = vst [vmem:[#allocation10 + $0x68] sm:$0xff] %v2046_v0 }
  0x50   : > { %304 = vst [vmem:[#allocation10 + $0x70] sm:$0xff] %v2046_v0 }
  0x51   : > { %305 = vst [vmem:[#allocation10 + $0x78] sm:$0xff] %v2046_v0 }
  0x52 PF: > { %s2181_s27 = sshll.u32 %s2032_s25, 7  ;;  %s2183_s28 = sld [smem:[#allocation3]] }
  0x53   : > { %s2186_s29 = sadd.s32 128, %s2181_s27  ;;  %s2188_s8 = sld [smem:[#allocation3 + $0x1]] }
  0x59   : > { %p1448_p1 = scmp.ge.s32.totalorder %s2181_s27, %s2188_s8 }
  0x5a   : > { %p642_p4 = scmp.ge.s32.totalorder (!%p1448_p1), %s2181_s27, %s2183_s28  ;;  %p643_p6 = scmp.le.s32.totalorder (!%p1448_p1), %s2186_s29, %s2188_s8 }
  0x5b   : > { %315 = sbr.rel (%p1448_p1) target bundleno = 1878 (0x756), region = 48  ;;  %p641_p8 = scmp.le.s32.totalorder (!%p1448_p1), %s2186_s29, %s2183_s28 }
  0x5c   : > { %p2289_p7 = pnand (!%p1448_p1), %p643_p6, %p642_p4  ;;  %p1513_p10 = scmp.gt.s32.totalorder (!%p1448_p1), %s2186_s29, %s2183_s28 }
  0x5e   : > { %p645_p9 = pneg (!%p1448_p1), %p2289_p7 }
  0x60   : > { %v1584_v1 = vld [vmem:[#allocation7 + $0x38] sm:$0xff]  ;;  %v1583_v2 = vld [vmem:[#allocation7 + $0x30] sm:$0xff]  ;;  %v1582_v3 = vld [vmem:[#allocation7 + $0x28] sm:$0xff] }
  0x61   : > { %448 = vmatpush.bf16.msra.mxu0 %v1584_v1  ;;  %1585 = vmatpush.bf16.msra.mxu1 %v1584_v1  ;;  %v1581_v4 = vld [vmem:[#allocation7 + $0x20] sm:$0xff]  ;;  %v1580_v5 = vld [vmem:[#allocation7 + $0x18] sm:$0xff]  ;;  %v1579_v6 = vld [vmem:[#allocation7 + $0x10] sm:$0xff] }
  0x62   : > { %1586 = vmatpush.bf16.msra.mxu2 %v1584_v1  ;;  %1587 = vmatpush.bf16.msra.mxu3 %v1584_v1  ;;  %v1578_v7 = vld [vmem:[#allocation7 + $0x8] sm:$0xff]  ;;  %v1577_v8 = vld [vmem:[#allocation7] sm:$0xff]  ;;  %v1571_v10 = vld [vmem:[%s2169_s18 + $0x10] sm:$0xff] }
  0x63   : > { %v1569_v9 = vld [vmem:[%s2169_s18] sm:$0xff]  ;;  %v1575_v12 = vld [vmem:[%s2169_s18 + $0x30] sm:$0xff]  ;;  %v1570_v13 = vld [vmem:[%s2169_s18 + $0x8] sm:$0xff] }
  0x64   : > { %v1573_v11 = vld [vmem:[%s2169_s18 + $0x20] sm:$0xff]  ;;  %v1572_v14 = vld [vmem:[%s2169_s18 + $0x18] sm:$0xff]  ;;  %v1574_v15 = vld [vmem:[%s2169_s18 + $0x28] sm:$0xff] }
  0x65   : > { %449 = vmatpush.bf16.msra.mxu0 %v1583_v2  ;;  %1588 = vmatpush.bf16.msra.mxu1 %v1583_v2  ;;  %v1576_v16 = vld [vmem:[%s2169_s18 + $0x38] sm:$0xff]  ;;  %v1759_v17 = vld [vmem:[%s2777_s3] ss:$0 sm:$0xff] }
  0x66   : > { %1589 = vmatpush.bf16.msra.mxu2 %v1583_v2  ;;  %1590 = vmatpush.bf16.msra.mxu3 %v1583_v2 }
  0x69   : > { %450 = vmatpush.bf16.msra.mxu0 %v1582_v3  ;;  %1591 = vmatpush.bf16.msra.mxu1 %v1582_v3 }
  0x6a   : > { %1592 = vmatpush.bf16.msra.mxu2 %v1582_v3  ;;  %1593 = vmatpush.bf16.msra.mxu3 %v1582_v3 }
  0x6d   : > { %451 = vmatpush.bf16.msra.mxu0 %v1581_v4  ;;  %1594 = vmatpush.bf16.msra.mxu1 %v1581_v4 }
  0x6e   : > { %1595 = vmatpush.bf16.msra.mxu2 %v1581_v4  ;;  %1596 = vmatpush.bf16.msra.mxu3 %v1581_v4 }
  0x71   : > { %452 = vmatpush.bf16.msra.mxu0 %v1580_v5  ;;  %1597 = vmatpush.bf16.msra.mxu1 %v1580_v5 }
  0x72   : > { %1598 = vmatpush.bf16.msra.mxu2 %v1580_v5  ;;  %1599 = vmatpush.bf16.msra.mxu3 %v1580_v5 }
  0x75   : > { %453 = vmatpush.bf16.msra.mxu0 %v1579_v6  ;;  %1600 = vmatpush.bf16.msra.mxu1 %v1579_v6 }
  0x76   : > { %1601 = vmatpush.bf16.msra.mxu2 %v1579_v6  ;;  %1602 = vmatpush.bf16.msra.mxu3 %v1579_v6 }
  0x79   : > { %454 = vmatpush.bf16.msra.mxu0 %v1578_v7  ;;  %1603 = vmatpush.bf16.msra.mxu1 %v1578_v7 }
  0x7a   : > { %1604 = vmatpush.bf16.msra.mxu2 %v1578_v7  ;;  %1605 = vmatpush.bf16.msra.mxu3 %v1578_v7 }
  0x7d   : > { %455 = vmatpush.bf16.msra.mxu0 %v1577_v8  ;;  %1606 = vmatpush.bf16.msra.mxu1 %v1577_v8 }
  0x7e   : > { %1607 = vmatpush.bf16.msra.mxu2 %v1577_v8  ;;  %1608 = vmatpush.bf16.msra.mxu3 %v1577_v8 }
  0x80   : > { %456 = vmatmul.bf16.vlgmr.msra.gmra.mxu0 %v1569_v9  ;;  %466 = vmatmul.bf16.vlgmr.msra.gmra.mxu1 %v1571_v10 }
  0x81   : > { %476 = vmatmul.bf16.vlgmr.msra.gmra.mxu2 %v1573_v11  ;;  %486 = vmatmul.bf16.vlgmr.msra.gmra.mxu3 %v1575_v12 }
  0x90   : > { %461 = vmatmul.bf16.gmra.mxu0 %v1570_v13  ;;  %471 = vmatmul.bf16.gmra.mxu1 %v1572_v14 }
  0x91   : > { %481 = vmatmul.bf16.gmra.mxu2 %v1574_v15  ;;  %491 = vmatmul.bf16.gmra.mxu3 %v1576_v16 }
  0xfd   : > { %v457_v18 = vpop.f32.mrf.mxu0  ;;  %v467_v19 = vpop.f32.mrf.mxu1 }
  0xfe   : > { %v458_v20 = vadd.f32 %v1759_v17, %v457_v18  ;;  %v468_v21 = vadd.f32 %v1759_v17, %v467_v19 }
 0x100   : > { %505 = vmax.xlane.f32.xlu2 %v468_v21  ;;  %497 = vmax.xlane.f32.xlu0 %v458_v20 }
 0x104   : > { %v477_v22 = vpop.f32.mrf.mxu2  ;;  %v487_v23 = vpop.f32.mrf.mxu3 }
 0x105   : > { %v478_v24 = vadd.f32 %v1759_v17, %v477_v22  ;;  %v488_v25 = vadd.f32 %v1759_v17, %v487_v23  ;;  %v459_v26 = vpop.f32.mrf.mxu0  ;;  %v469_v27 = vpop.f32.mrf.mxu1 }
 0x106   : > { %v470_v30 = vadd.f32 %v1759_v17, %v469_v27  ;;  %v460_v32 = vadd.f32 %v1759_v17, %v459_v26 }
 0x108   : > { %513 = vmax.xlane.f32.xlu2 %v478_v24  ;;  %521 = vmax.xlane.f32.xlu0 %v488_v25 }
 0x10c   : > { %v479_v28 = vpop.f32.mrf.mxu2  ;;  %v489_v33 = vpop.f32.mrf.mxu3 }
 0x10d   : > { %v462_v29 = vpop.f32.mrf.mxu0  ;;  %v2208_v36 = vadd.f32 %v1759_v17, %v479_v28  ;;  %v472_v38 = vpop.f32.mrf.mxu1  ;;  %v2230_v49 = vadd.f32 %v1759_v17, %v489_v33 }
 0x10e   : > { %v2203_v31 = vadd.f32 %v1759_v17, %v462_v29  ;;  %v2212_v41 = vadd.f32 %v1759_v17, %v472_v38 }
 0x110   : > { %507 = vmax.xlane.f32.xlu2 %v470_v30  ;;  %501 = vmax.xlane.f32.xlu1 %v2203_v31 }
 0x111   : > { %499 = vmax.xlane.f32.xlu0 %v460_v32 }
 0x114   : > { %v482_v34 = vpop.f32.mrf.mxu2  ;;  %v492_v37 = vpop.f32.mrf.mxu3 }
 0x115   : > { %v2206_v35 = vadd.f32 %v1759_v17, %v482_v34  ;;  %v464_v39 = vpop.f32.mrf.mxu0  ;;  %v474_v45 = vpop.f32.mrf.mxu1  ;;  %v2221_v46 = vadd.f32 %v1759_v17, %v492_v37 }
 0x116   : > { %v2216_v43 = vadd.f32 %v1759_v17, %v464_v39  ;;  %v2225_v48 = vadd.f32 %v1759_v17, %v474_v45 }
 0x118   : > { %517 = vmax.xlane.f32.xlu1 %v2206_v35 }
 0x119   : > { %515 = vmax.xlane.f32.xlu0 %v2208_v36 }
 0x11c   : > { %v484_v40 = vpop.f32.mrf.mxu2  ;;  %v494_v44 = vpop.f32.mrf.mxu3 }
 0x11d   : > { %v2214_v42 = vadd.f32 %v1759_v17, %v484_v40  ;;  %v2223_v47 = vadd.f32 %v1759_v17, %v494_v44 }
 0x11f   : > { %519 = vmax.xlane.f32.xlu2 %v2214_v42 }
 0x120   : > { %503 = vmax.xlane.f32.xlu1 %v2216_v43 }
 0x121   : > { %509 = vmax.xlane.f32.xlu0 %v2212_v41 }
 0x127   : > { %525 = vmax.xlane.f32.xlu2 %v2221_v46 }
 0x128   : > { %511 = vmax.xlane.f32.xlu1 %v2225_v48 }
 0x129   : > { %527 = vmax.xlane.f32.xlu0 %v2223_v47 }
 0x130   : > { %523 = vmax.xlane.f32.xlu1 %v2230_v49 }
 0x173   : > { %v506_v50 = vpop.xlane.xlu2 %505  ;;  %v498_v51 = vpop.xlane.xlu0 %497 }
 0x174   : > { %v533_v52 = vsub.f32 %v468_v21, %v506_v50  ;;  %v529_v53 = vsub.f32 %v458_v20, %v498_v51 }
 0x176   : > { %v553_v54 = vmul.f32 1.442695, %v533_v52  ;;  %v545_v55 = vmul.f32 1.442695, %v529_v53 }
 0x178   : > { %1760 = vpow2.f32 %v553_v54 }
 0x179   : > { %1762 = vpow2.f32 %v545_v55 }
 0x17b   : > { %v514_v56 = vpop.xlane.xlu2 %513  ;;  %v522_v57 = vpop.xlane.xlu0 %521 }
 0x17c   : > { %v537_v58 = vsub.f32 %v478_v24, %v514_v56  ;;  %v541_v59 = vsub.f32 %v488_v25, %v522_v57 }
 0x17e   : > { %v2233_v60 = vpop.eup %1760  ;;  %v561_v61 = vmul.f32 1.442695, %v537_v58  ;;  %v569_v62 = vmul.f32 1.442695, %v541_v59 }
 0x17f   : > { %v2235_v63 = vpop.eup %1762  ;;  %585 = vadd.xlane.f32.xlu2 %v2233_v60 }
 0x180   : > { %1764 = vpow2.f32 %v561_v61  ;;  %577 = vadd.xlane.f32.xlu1 %v2235_v63 }
 0x181   : > { %1766 = vpow2.f32 %v569_v62 }
 0x183   : > { %v508_v0 = vpop.xlane.xlu2 %507  ;;  %v502_v1 = vpop.xlane.xlu1 %501 }
 0x184   : > { %v534_v2 = vsub.f32 %v470_v30, %v508_v0  ;;  %v500_v3 = vpop.xlane.xlu0 %499  ;;  %v531_v8 = vsub.f32 %v2203_v31, %v502_v1 }
 0x185   : > { %v530_v4 = vsub.f32 %v460_v32, %v500_v3 }
 0x186   : > { %v2239_v5 = vpop.eup %1764  ;;  %v555_v6 = vmul.f32 1.442695, %v534_v2  ;;  %v549_v10 = vmul.f32 1.442695, %v531_v8 }
 0x187   : > { %v2241_v7 = vpop.eup %1766  ;;  %v547_v9 = vmul.f32 1.442695, %v530_v4  ;;  %593 = vadd.xlane.f32.xlu0 %v2239_v5 }
 0x188   : > { %1768 = vpow2.f32 %v555_v6  ;;  %601 = vadd.xlane.f32.xlu1 %v2241_v7 }
 0x189   : > { %1770 = vpow2.f32 %v547_v9 }
 0x18a   : > { %1772 = vpow2.f32 %v549_v10 }
 0x18b   : > { %v518_v11 = vpop.xlane.xlu1 %517 }
 0x18c   : > { %v539_v12 = vsub.f32 %v2206_v35, %v518_v11  ;;  %v516_v13 = vpop.xlane.xlu0 %515 }
 0x18d   : > { %v538_v14 = vsub.f32 %v2208_v36, %v516_v13 }
 0x18e   : > { %v2248_v15 = vpop.eup %1768  ;;  %v565_v16 = vmul.f32 1.442695, %v539_v12 }
 0x18f   : > { %v563_v17 = vmul.f32 1.442695, %v538_v14  ;;  %587 = vadd.xlane.f32.xlu0 %v2248_v15  ;;  %v2251_v18 = vpop.eup %1770 }
 0x190   : > { %1774 = vpow2.f32 %v565_v16  ;;  %579 = vadd.xlane.f32.xlu2 %v2251_v18  ;;  %v2255_v23 = vpop.eup %1772 }
 0x191   : > { %1776 = vpow2.f32 %v563_v17 }
 0x192   : > { %v520_v19 = vpop.xlane.xlu2 %519 }
 0x193   : > { %v540_v20 = vsub.f32 %v2214_v42, %v520_v19  ;;  %v504_v21 = vpop.xlane.xlu1 %503 }
 0x194   : > { %v510_v22 = vpop.xlane.xlu0 %509  ;;  %v532_v29 = vsub.f32 %v2216_v43, %v504_v21 }
 0x195   : > { %v567_v24 = vmul.f32 1.442695, %v540_v20  ;;  %v535_v25 = vsub.f32 %v2212_v41, %v510_v22 }
 0x196   : > { %v2258_v26 = vpop.eup %1774  ;;  %v551_v34 = vmul.f32 1.442695, %v532_v29 }
 0x197   : > { %v2260_v27 = vpop.eup %1776  ;;  %v557_v28 = vmul.f32 1.442695, %v535_v25  ;;  %581 = vadd.xlane.f32.xlu0 %v2255_v23  ;;  %1778 = vpow2.f32 %v567_v24 }
 0x198   : > { %595 = vadd.xlane.f32.xlu1 %v2260_v27  ;;  %597 = vadd.xlane.f32.xlu2 %v2258_v26 }
 0x199   : > { %1780 = vpow2.f32 %v557_v28 }
 0x19a   : > { %v526_v30 = vpop.xlane.xlu2 %525 }
 0x19b   : > { %v543_v31 = vsub.f32 %v2221_v46, %v526_v30  ;;  %v512_v32 = vpop.xlane.xlu1 %511 }
 0x19c   : > { %v536_v33 = vsub.f32 %v2225_v48, %v512_v32  ;;  %v528_v38 = vpop.xlane.xlu0 %527 }
 0x19d   : > { %v573_v35 = vmul.f32 1.442695, %v543_v31  ;;  %v2268_v36 = vpop.eup %1778  ;;  %v544_v40 = vsub.f32 %v2223_v47, %v528_v38 }
 0x19e   : > { %v559_v37 = vmul.f32 1.442695, %v536_v33 }
 0x19f   : > { %v2270_v39 = vpop.eup %1780  ;;  %1782 = vpow2.f32 %v573_v35  ;;  %599 = vadd.xlane.f32.xlu0 %v2268_v36  ;;  %v575_v44 = vmul.f32 1.442695, %v544_v40 }
 0x1a0   : > { %1784 = vpow2.f32 %v559_v37  ;;  %589 = vadd.xlane.f32.xlu1 %v2270_v39 }
 0x1a1   : > { %1786 = vpow2.f32 %v551_v34 }
 0x1a3   : > { %v524_v41 = vpop.xlane.xlu1 %523 }
 0x1a4   : > { %v542_v42 = vsub.f32 %v2230_v49, %v524_v41 }
 0x1a5   : > { %v2276_v43 = vpop.eup %1782 }
 0x1a6   : > { %v2278_v45 = vpop.eup %1784  ;;  %v571_v46 = vmul.f32 1.442695, %v542_v42 }
 0x1a7   : > { %v2280_v48 = vpop.eup %1786  ;;  %605 = vadd.xlane.f32.xlu0 %v2276_v43  ;;  %591 = vadd.xlane.f32.xlu2 %v2278_v45 }
 0x1a8   : > { %1788 = vpow2.f32 %v571_v46  ;;  %583 = vadd.xlane.f32.xlu1 %v2280_v48 }
 0x1a9   : > { %1790 = vpow2.f32 %v575_v44 }
 0x1ae   : > { %v2297_v47 = vpop.eup %1788 }
 0x1af   : > { %v2299_v49 = vpop.eup %1790  ;;  %603 = vadd.xlane.f32.xlu2 %v2297_v47 }
 0x1b0   : > { %607 = vadd.xlane.f32.xlu1 %v2299_v49 }
 0x1f2   : > { %v586_v50 = vpop.xlane.xlu2 %585 }
 0x1f3   : > { %1792 = vrcp.f32 %v586_v50  ;;  %v578_v51 = vpop.xlane.xlu1 %577 }
 0x1f4   : > { %1794 = vrcp.f32 %v578_v51 }
 0x1f9   : > { %v1793_v52 = vpop.eup %1792 }
 0x1fa   : > { %v1795_v53 = vpop.eup %1794  ;;  %v2304_v54 = vmul.f32 %v1793_v52, %v2233_v60  ;;  %v594_v55 = vpop.xlane.xlu0 %593 }
 0x1fb   : > { %v2307_v56 = vmul.f32 %v1795_v53, %v2235_v63  ;;  %v602_v57 = vpop.xlane.xlu1 %601  ;;  %1796 = vrcp.f32 %v594_v55 }
 0x1fc   : > { %1798 = vrcp.f32 %v602_v57 }
 0x201   : > { %v1797_v58 = vpop.eup %1796 }
 0x202   : > { %v1799_v59 = vpop.eup %1798  ;;  %v2310_v61 = vmul.f32 %v1797_v58, %v2239_v5  ;;  %v588_v62 = vpop.xlane.xlu0 %587 }
 0x203   : > { %v2313_v0 = vmul.f32 %v1799_v59, %v2241_v7  ;;  %1800 = vrcp.f32 %v588_v62  ;;  %v580_v1 = vpop.xlane.xlu2 %579 }
 0x204   : > { %1802 = vrcp.f32 %v580_v1 }
 0x209   : > { %v1801_v60 = vpop.eup %1800 }
 0x20a   : > { %v2316_v2 = vmul.f32 %v1801_v60, %v2248_v15  ;;  %v582_v63 = vpop.xlane.xlu0 %581  ;;  %v1803_v3 = vpop.eup %1802 }
 0x20b   : > { %v596_v4 = vpop.xlane.xlu1 %595  ;;  %1804 = vrcp.f32 %v582_v63  ;;  %v2319_v6 = vmul.f32 %v1803_v3, %v2251_v18  ;;  %v598_v5 = vpop.xlane.xlu2 %597 }
 0x20c   : > { %1806 = vrcp.f32 %v596_v4 }
 0x20d   : > { %1808 = vrcp.f32 %v598_v5 }
 0x211   : > { %v1805_v8 = vpop.eup %1804 }
 0x212   : > { %v1807_v7 = vpop.eup %1806  ;;  %v2322_v9 = vmul.f32 %v1805_v8, %v2255_v23  ;;  %v600_v10 = vpop.xlane.xlu0 %599 }
 0x213   : > { %v1809_v11 = vpop.eup %1808  ;;  %v2325_v12 = vmul.f32 %v1807_v7, %v2260_v27  ;;  %v590_v13 = vpop.xlane.xlu1 %589  ;;  %1810 = vrcp.f32 %v600_v10 }
 0x214   : > { %v2328_v14 = vmul.f32 %v1809_v11, %v2258_v26  ;;  %1812 = vrcp.f32 %v590_v13 }
 0x219   : > { %v1811_v15 = vpop.eup %1810 }
 0x21a   : > { %v1813_v16 = vpop.eup %1812  ;;  %v2331_v17 = vmul.f32 %v1811_v15, %v2268_v36  ;;  %v592_v18 = vpop.xlane.xlu2 %591 }
 0x21b   : > { %v606_v19 = vpop.xlane.xlu0 %605  ;;  %v2334_v20 = vmul.f32 %v1813_v16, %v2270_v39  ;;  %1814 = vrcp.f32 %v592_v18  ;;  %v584_v21 = vpop.xlane.xlu1 %583 }
 0x21c   : > { %1816 = vrcp.f32 %v584_v21 }
 0x21d   : > { %1818 = vrcp.f32 %v606_v19 }
 0x221   : > { %v1815_v22 = vpop.eup %1814 }
 0x222   : > { %v1817_v23 = vpop.eup %1816  ;;  %v2337_v24 = vmul.f32 %v1815_v22, %v2278_v45  ;;  %v604_v25 = vpop.xlane.xlu2 %603 }
 0x223   : > { %v1819_v26 = vpop.eup %1818  ;;  %v2340_v27 = vmul.f32 %v1817_v23, %v2280_v48  ;;  %1820 = vrcp.f32 %v604_v25  ;;  %v608_v28 = vpop.xlane.xlu1 %607 }
 0x224   : > { %v2343_v29 = vmul.f32 %v1819_v26, %v2276_v43  ;;  %1822 = vrcp.f32 %v608_v28 }
 0x227   : > { %648 = sbr.rel (%p1513_p10) target bundleno = 986 (0x3da), region = 52 }
 0x229   : > { %v1821_v30 = vpop.eup %1820 }
 0x22a   : > { %v1823_v31 = vpop.eup %1822  ;;  %v2346_v32 = vmul.f32 %v1821_v30, %v2297_v47 }
 0x22b   : > { %v2349_v33 = vmul.f32 %v1823_v31, %v2299_v49 }
 0x22c   : > { %v649_v34 = vpack.c.bf16 %v2319_v6, %v2307_v56  ;;  %v650_v35 = vpack.c.bf16 %v2340_v27, %v2322_v9  ;;  %v651_v36 = vpack.c.bf16 %v2316_v2, %v2304_v54  ;;  %v652_v37 = vpack.c.bf16 %v2337_v24, %v2334_v20  ;;  %v657_v50 = vld [vmem:[#allocation9] sm:$0xff]  ;;  %v658_v53 = vld [vmem:[#allocation9 + $0x8] sm:$0xff]  ;;  %v659_v58 = vld [vmem:[#allocation9 + $0x10] sm:$0xff] }
 0x22d   : > { %v653_v38 = vpack.c.bf16 %v2325_v12, %v2310_v61  ;;  %v656_v39 = vpack.c.bf16 %v2349_v33, %v2343_v29  ;;  %v655_v40 = vpack.c.bf16 %v2346_v32, %v2313_v0  ;;  %v654_v41 = vpack.c.bf16 %v2331_v17, %v2328_v14  ;;  %v660_v1 = vld [vmem:[#allocation9 + $0x18] sm:$0xff]  ;;  %v661_v3 = vld [vmem:[#allocation9 + $0x20] sm:$0xff]  ;;  %v662_v8 = vld [vmem:[#allocation9 + $0x28] sm:$0xff] }
 0x22e   : > { %673 = vxpose.xlu0.c.b16.start [1/8] %v649_v34, 128  ;;  %v663_v11 = vld [vmem:[#allocation9 + $0x30] sm:$0xff]  ;;  %v664_v16 = vld [vmem:[#allocation9 + $0x38] sm:$0xff]  ;;  %v665_v21 = vld [vmem:[#allocation9 + $0x40] sm:$0xff] }
 0x22f   : > { %689 = vmatpush.bf16.msra.mxu0 %v656_v39  ;;  %1609 = vmatpush.bf16.msra.mxu1 %v656_v39  ;;  %v666_v25 = vld [vmem:[#allocation9 + $0x48] sm:$0xff]  ;;  %v667_v30 = vld [vmem:[#allocation9 + $0x50] sm:$0xff] }
 0x230   : > { %1610 = vmatpush.bf16.msra.mxu2 %v656_v39  ;;  %1611 = vmatpush.bf16.msra.mxu3 %v656_v39 }
 0x233   : > { %690 = vmatpush.bf16.msra.mxu0 %v655_v40  ;;  %1612 = vmatpush.bf16.msra.mxu1 %v655_v40 }
 0x234   : > { %1613 = vmatpush.bf16.msra.mxu2 %v655_v40  ;;  %1614 = vmatpush.bf16.msra.mxu3 %v655_v40 }
 0x237   : > { %691 = vmatpush.bf16.msra.mxu0 %v654_v41  ;;  %1615 = vmatpush.bf16.msra.mxu1 %v654_v41 }
 0x238   : > { %1616 = vmatpush.bf16.msra.mxu2 %v654_v41  ;;  %1617 = vmatpush.bf16.msra.mxu3 %v654_v41 }
 0x23b   : > { %692 = vmatpush.bf16.msra.mxu0 %v653_v38  ;;  %1618 = vmatpush.bf16.msra.mxu1 %v653_v38 }
 0x23c   : > { %1619 = vmatpush.bf16.msra.mxu2 %v653_v38  ;;  %1620 = vmatpush.bf16.msra.mxu3 %v653_v38 }
 0x23e   : > { %674 = vxpose.xlu0.c.b16.cont [2/8] %v650_v35, 128 }
 0x23f   : > { %693 = vmatpush.bf16.msra.mxu0 %v652_v37  ;;  %1621 = vmatpush.bf16.msra.mxu1 %v652_v37 }
 0x240   : > { %1622 = vmatpush.bf16.msra.mxu2 %v652_v37  ;;  %1623 = vmatpush.bf16.msra.mxu3 %v652_v37 }
 0x243   : > { %694 = vmatpush.bf16.msra.mxu0 %v651_v36  ;;  %1624 = vmatpush.bf16.msra.mxu1 %v651_v36 }
 0x244   : > { %1625 = vmatpush.bf16.msra.mxu2 %v651_v36  ;;  %1626 = vmatpush.bf16.msra.mxu3 %v651_v36 }
 0x247   : > { %695 = vmatpush.bf16.msra.mxu0 %v650_v35  ;;  %1627 = vmatpush.bf16.msra.mxu1 %v650_v35 }
 0x248   : > { %1628 = vmatpush.bf16.msra.mxu2 %v650_v35  ;;  %1629 = vmatpush.bf16.msra.mxu3 %v650_v35  ;;  %v668_v35 = vld [vmem:[#allocation9 + $0x58] sm:$0xff] }
 0x24b   : > { %696 = vmatpush.bf16.msra.mxu0 %v649_v34  ;;  %1630 = vmatpush.bf16.msra.mxu1 %v649_v34 }
 0x24c   : > { %1631 = vmatpush.bf16.msra.mxu2 %v649_v34  ;;  %1632 = vmatpush.bf16.msra.mxu3 %v649_v34 }
 0x24e   : > { %675 = vxpose.xlu0.c.b16.cont [3/8] %v651_v36, 128 }
 0x25e   : > { %676 = vxpose.xlu0.c.b16.cont [4/8] %v652_v37, 128 }
 0x26e   : > { %677 = vxpose.xlu0.c.b16.cont [5/8] %v653_v38, 128  ;;  %v669_v38 = vld [vmem:[#allocation9 + $0x60] sm:$0xff] }
 0x27e   : > { %678 = vxpose.xlu0.c.b16.cont [6/8] %v654_v41, 128  ;;  %v670_v41 = vld [vmem:[#allocation9 + $0x68] sm:$0xff] }
 0x28e   : > { %679 = vxpose.xlu0.c.b16.cont [7/8] %v655_v40, 128 }
 0x29e   : > { %680 = vxpose.xlu0.c.b16.end [8/8] %v656_v39, 128 }
 0x2da   : > { %v681_v42 = vpop.trf.xlu0 }
 0x2db   : > { %697 = vmatmul.bf16.vlgmr.msra.gmra.mxu0 %v681_v42 }
 0x2ea   : > { %v682_v43 = vpop.trf.xlu0 }
 0x2eb   : > { %702 = vmatmul.bf16.gmra.mxu0 %v682_v43 }
 0x2fa   : > { %v683_v44 = vpop.trf.xlu0 }
 0x2fb   : > { %707 = vmatmul.bf16.vlgmr.msra.gmra.mxu1 %v683_v44  ;;  %v671_v44 = vld [vmem:[#allocation9 + $0x70] sm:$0xff] }
 0x30a   : > { %v684_v45 = vpop.trf.xlu0 }
 0x30b   : > { %712 = vmatmul.bf16.gmra.mxu1 %v684_v45 }
 0x31a   : > { %v685_v46 = vpop.trf.xlu0 }
 0x31b   : > { %717 = vmatmul.bf16.vlgmr.msra.gmra.mxu2 %v685_v46 }
 0x32a   : > { %v686_v48 = vpop.trf.xlu0 }
 0x32b   : > { %722 = vmatmul.bf16.gmra.mxu2 %v686_v48  ;;  %v672_v48 = vld [vmem:[#allocation9 + $0x78] sm:$0xff] }
 0x33a   : > { %v687_v47 = vpop.trf.xlu0 }
 0x33b   : > { %727 = vmatmul.bf16.vlgmr.msra.gmra.mxu3 %v687_v47 }
 0x34a   : > { %v688_v49 = vpop.trf.xlu0 }
 0x34b   : > { %732 = vmatmul.bf16.gmra.mxu3 %v688_v49 }
 0x358   : > { %v698_v51 = vpop.f32.mrf.mxu0 }
 0x359   : > { %v738_v52 = vadd.f32 %v698_v51, %v657_v50 }
 0x35b   : > { %754 = vst [vmem:[#allocation9] sm:$0xff] %v738_v52 }
 0x360   : > { %v700_v55 = vpop.f32.mrf.mxu0 }
 0x361   : > { %v739_v57 = vadd.f32 %v700_v55, %v658_v53 }
 0x363   : > { %755 = vst [vmem:[#allocation9 + $0x8] sm:$0xff] %v739_v57 }
 0x368   : > { %v703_v59 = vpop.f32.mrf.mxu0 }
 0x369   : > { %v740_v62 = vadd.f32 %v703_v59, %v659_v58 }
 0x36b   : > { %756 = vst [vmem:[#allocation9 + $0x10] sm:$0xff] %v740_v62 }
 0x370   : > { %v705_v60 = vpop.f32.mrf.mxu0 }
 0x371   : > { %v741_v63 = vadd.f32 %v705_v60, %v660_v1 }
 0x373   : > { %757 = vst [vmem:[#allocation9 + $0x18] sm:$0xff] %v741_v63 }
 0x378   : > { %v708_v4 = vpop.f32.mrf.mxu1 }
 0x379   : > { %v742_v5 = vadd.f32 %v708_v4, %v661_v3 }
 0x37b   : > { %758 = vst [vmem:[#allocation9 + $0x20] sm:$0xff] %v742_v5 }
 0x380   : > { %v710_v7 = vpop.f32.mrf.mxu1 }
 0x381   : > { %v743_v10 = vadd.f32 %v710_v7, %v662_v8 }
 0x383   : > { %759 = vst [vmem:[#allocation9 + $0x28] sm:$0xff] %v743_v10 }
 0x388   : > { %v713_v13 = vpop.f32.mrf.mxu1 }
 0x389   : > { %v744_v15 = vadd.f32 %v713_v13, %v663_v11 }
 0x38b   : > { %760 = vst [vmem:[#allocation9 + $0x30] sm:$0xff] %v744_v15 }
 0x390   : > { %v715_v18 = vpop.f32.mrf.mxu1 }
 0x391   : > { %v745_v19 = vadd.f32 %v715_v18, %v664_v16 }
 0x393   : > { %761 = vst [vmem:[#allocation9 + $0x38] sm:$0xff] %v745_v19 }
 0x39e   : > { %v718_v22 = vpop.f32.mrf.mxu2 }
 0x39f   : > { %v746_v23 = vadd.f32 %v718_v22, %v665_v21 }
 0x3a1   : > { %762 = vst [vmem:[#allocation9 + $0x40] sm:$0xff] %v746_v23 }
 0x3a6   : > { %v720_v26 = vpop.f32.mrf.mxu2 }
 0x3a7   : > { %v747_v28 = vadd.f32 %v720_v26, %v666_v25 }
 0x3a9   : > { %763 = vst [vmem:[#allocation9 + $0x48] sm:$0xff] %v747_v28 }
 0x3ae   : > { %v723_v31 = vpop.f32.mrf.mxu2 }
 0x3af   : > { %v748_v34 = vadd.f32 %v723_v31, %v667_v30 }
 0x3b1   : > { %764 = vst [vmem:[#allocation9 + $0x50] sm:$0xff] %v748_v34 }
 0x3b6   : > { %v725_v36 = vpop.f32.mrf.mxu2 }
 0x3b7   : > { %v749_v37 = vadd.f32 %v725_v36, %v668_v35 }
 0x3b9   : > { %765 = vst [vmem:[#allocation9 + $0x58] sm:$0xff] %v749_v37 }
 0x3be   : > { %v728_v39 = vpop.f32.mrf.mxu3 }
 0x3bf   : > { %v750_v40 = vadd.f32 %v728_v39, %v669_v38 }
 0x3c1   : > { %766 = vst [vmem:[#allocation9 + $0x60] sm:$0xff] %v750_v40 }
 0x3c6   : > { %v730_v42 = vpop.f32.mrf.mxu3 }
 0x3c7   : > { %v751_v43 = vadd.f32 %v730_v42, %v670_v41 }
 0x3c9   : > { %767 = vst [vmem:[#allocation9 + $0x68] sm:$0xff] %v751_v43 }
 0x3ce   : > { %v733_v45 = vpop.f32.mrf.mxu3 }
 0x3cf   : > { %v752_v46 = vadd.f32 %v733_v45, %v671_v44 }
 0x3d1   : > { %768 = vst [vmem:[#allocation9 + $0x70] sm:$0xff] %v752_v46 }
 0x3d6   : > { %v735_v47 = vpop.f32.mrf.mxu3 }
 0x3d7   : > { %v753_v49 = vadd.f32 %v735_v47, %v672_v48 }
 0x3d9   : > { %769 = vst [vmem:[#allocation9 + $0x78] sm:$0xff] %v753_v49 }
 0x3da PF: > { %771 = sbr.rel (%p2289_p7) target bundleno = 1421 (0x58d), region = 56 }
 0x3df   : > { %v772_v50 = vpack.c.bf16 %v2319_v6, %v2307_v56  ;;  %v773_v51 = vpack.c.bf16 %v2340_v27, %v2322_v9  ;;  %v774_v52 = vpack.c.bf16 %v2316_v2, %v2304_v54  ;;  %v775_v53 = vpack.c.bf16 %v2337_v24, %v2334_v20  ;;  %v780_v7 = vld [vmem:[#allocation10] sm:$0xff]  ;;  %v781_v13 = vld [vmem:[#allocation10 + $0x8] sm:$0xff]  ;;  %v782_v18 = vld [vmem:[#allocation10 + $0x10] sm:$0xff] }
 0x3e0   : > { %v776_v55 = vpack.c.bf16 %v2325_v12, %v2310_v61  ;;  %v779_v57 = vpack.c.bf16 %v2349_v33, %v2343_v29  ;;  %v778_v58 = vpack.c.bf16 %v2346_v32, %v2313_v0  ;;  %v777_v59 = vpack.c.bf16 %v2331_v17, %v2328_v14  ;;  %v783_v22 = vld [vmem:[#allocation10 + $0x18] sm:$0xff]  ;;  %v784_v26 = vld [vmem:[#allocation10 + $0x20] sm:$0xff]  ;;  %v785_v31 = vld [vmem:[#allocation10 + $0x28] sm:$0xff] }
 0x3e1   : > { %796 = vxpose.xlu0.c.b16.start [1/8] %v772_v50, 128  ;;  %v786_v36 = vld [vmem:[#allocation10 + $0x30] sm:$0xff]  ;;  %v787_v39 = vld [vmem:[#allocation10 + $0x38] sm:$0xff]  ;;  %v788_v42 = vld [vmem:[#allocation10 + $0x40] sm:$0xff] }
 0x3e2   : > { %812 = vmatpush.bf16.msra.mxu0 %v779_v57  ;;  %1633 = vmatpush.bf16.msra.mxu1 %v779_v57  ;;  %v789_v45 = vld [vmem:[#allocation10 + $0x48] sm:$0xff]  ;;  %v790_v47 = vld [vmem:[#allocation10 + $0x50] sm:$0xff] }
 0x3e3   : > { %1634 = vmatpush.bf16.msra.mxu2 %v779_v57  ;;  %1635 = vmatpush.bf16.msra.mxu3 %v779_v57 }
 0x3e6   : > { %813 = vmatpush.bf16.msra.mxu0 %v778_v58  ;;  %1636 = vmatpush.bf16.msra.mxu1 %v778_v58 }
 0x3e7   : > { %1637 = vmatpush.bf16.msra.mxu2 %v778_v58  ;;  %1638 = vmatpush.bf16.msra.mxu3 %v778_v58 }
 0x3ea   : > { %814 = vmatpush.bf16.msra.mxu0 %v777_v59  ;;  %1639 = vmatpush.bf16.msra.mxu1 %v777_v59 }
 0x3eb   : > { %1640 = vmatpush.bf16.msra.mxu2 %v777_v59  ;;  %1641 = vmatpush.bf16.msra.mxu3 %v777_v59 }
 0x3ee   : > { %815 = vmatpush.bf16.msra.mxu0 %v776_v55  ;;  %1642 = vmatpush.bf16.msra.mxu1 %v776_v55 }
 0x3ef   : > { %1643 = vmatpush.bf16.msra.mxu2 %v776_v55  ;;  %1644 = vmatpush.bf16.msra.mxu3 %v776_v55 }
 0x3f1   : > { %797 = vxpose.xlu0.c.b16.cont [2/8] %v773_v51, 128 }
 0x3f2   : > { %816 = vmatpush.bf16.msra.mxu0 %v775_v53  ;;  %1645 = vmatpush.bf16.msra.mxu1 %v775_v53 }
 0x3f3   : > { %1646 = vmatpush.bf16.msra.mxu2 %v775_v53  ;;  %1647 = vmatpush.bf16.msra.mxu3 %v775_v53 }
 0x3f6   : > { %817 = vmatpush.bf16.msra.mxu0 %v774_v52  ;;  %1648 = vmatpush.bf16.msra.mxu1 %v774_v52 }
 0x3f7   : > { %1649 = vmatpush.bf16.msra.mxu2 %v774_v52  ;;  %1650 = vmatpush.bf16.msra.mxu3 %v774_v52 }
 0x3fa   : > { %818 = vmatpush.bf16.msra.mxu0 %v773_v51  ;;  %1651 = vmatpush.bf16.msra.mxu1 %v773_v51 }
 0x3fb   : > { %1652 = vmatpush.bf16.msra.mxu2 %v773_v51  ;;  %1653 = vmatpush.bf16.msra.mxu3 %v773_v51  ;;  %v791_v51 = vld [vmem:[#allocation10 + $0x58] sm:$0xff] }
 0x3fe   : > { %819 = vmatpush.bf16.msra.mxu0 %v772_v50  ;;  %1654 = vmatpush.bf16.msra.mxu1 %v772_v50 }
 0x3ff   : > { %1655 = vmatpush.bf16.msra.mxu2 %v772_v50  ;;  %1656 = vmatpush.bf16.msra.mxu3 %v772_v50 }
 0x401   : > { %798 = vxpose.xlu0.c.b16.cont [3/8] %v774_v52, 128 }
 0x411   : > { %799 = vxpose.xlu0.c.b16.cont [4/8] %v775_v53, 128 }
 0x421   : > { %800 = vxpose.xlu0.c.b16.cont [5/8] %v776_v55, 128  ;;  %v792_v55 = vld [vmem:[#allocation10 + $0x60] sm:$0xff] }
 0x431   : > { %801 = vxpose.xlu0.c.b16.cont [6/8] %v777_v59, 128  ;;  %v793_v59 = vld [vmem:[#allocation10 + $0x68] sm:$0xff] }
 0x441   : > { %802 = vxpose.xlu0.c.b16.cont [7/8] %v778_v58, 128 }
 0x451   : > { %803 = vxpose.xlu0.c.b16.end [8/8] %v779_v57, 128 }
 0x48d   : > { %v804_v62 = vpop.trf.xlu0 }
 0x48e   : > { %820 = vmatmul.bf16.vlgmr.msra.gmra.mxu0 %v804_v62 }
 0x49d   : > { %v805_v1 = vpop.trf.xlu0 }
 0x49e   : > { %825 = vmatmul.bf16.gmra.mxu0 %v805_v1 }
 0x4ad   : > { %v806_v60 = vpop.trf.xlu0 }
 0x4ae   : > { %830 = vmatmul.bf16.vlgmr.msra.gmra.mxu1 %v806_v60  ;;  %v794_v60 = vld [vmem:[#allocation10 + $0x70] sm:$0xff] }
 0x4bd   : > { %v807_v63 = vpop.trf.xlu0 }
 0x4be   : > { %835 = vmatmul.bf16.gmra.mxu1 %v807_v63 }
 0x4cd   : > { %v808_v3 = vpop.trf.xlu0 }
 0x4ce   : > { %840 = vmatmul.bf16.vlgmr.msra.gmra.mxu2 %v808_v3 }
 0x4dd   : > { %v809_v4 = vpop.trf.xlu0 }
 0x4de   : > { %845 = vmatmul.bf16.gmra.mxu2 %v809_v4  ;;  %v795_v4 = vld [vmem:[#allocation10 + $0x78] sm:$0xff] }
 0x4ed   : > { %v810_v5 = vpop.trf.xlu0 }
 0x4ee   : > { %850 = vmatmul.bf16.vlgmr.msra.gmra.mxu3 %v810_v5 }
 0x4fd   : > { %v811_v8 = vpop.trf.xlu0 }
 0x4fe   : > { %855 = vmatmul.bf16.gmra.mxu3 %v811_v8 }
 0x50b   : > { %v821_v10 = vpop.f32.mrf.mxu0 }
 0x50c   : > { %v861_v11 = vadd.f32 %v821_v10, %v780_v7 }
 0x50e   : > { %877 = vst [vmem:[#allocation10] sm:$0xff] %v861_v11 }
 0x513   : > { %v823_v15 = vpop.f32.mrf.mxu0 }
 0x514   : > { %v862_v16 = vadd.f32 %v823_v15, %v781_v13 }
 0x516   : > { %878 = vst [vmem:[#allocation10 + $0x8] sm:$0xff] %v862_v16 }
 0x51b   : > { %v826_v19 = vpop.f32.mrf.mxu0 }
 0x51c   : > { %v863_v21 = vadd.f32 %v826_v19, %v782_v18 }
 0x51e   : > { %879 = vst [vmem:[#allocation10 + $0x10] sm:$0xff] %v863_v21 }
 0x523   : > { %v828_v23 = vpop.f32.mrf.mxu0 }
 0x524   : > { %v864_v25 = vadd.f32 %v828_v23, %v783_v22 }
 0x526   : > { %880 = vst [vmem:[#allocation10 + $0x18] sm:$0xff] %v864_v25 }
 0x52b   : > { %v831_v28 = vpop.f32.mrf.mxu1 }
 0x52c   : > { %v865_v30 = vadd.f32 %v831_v28, %v784_v26 }
 0x52e   : > { %881 = vst [vmem:[#allocation10 + $0x20] sm:$0xff] %v865_v30 }
 0x533   : > { %v833_v34 = vpop.f32.mrf.mxu1 }
 0x534   : > { %v866_v35 = vadd.f32 %v833_v34, %v785_v31 }
 0x536   : > { %882 = vst [vmem:[#allocation10 + $0x28] sm:$0xff] %v866_v35 }
 0x53b   : > { %v836_v37 = vpop.f32.mrf.mxu1 }
 0x53c   : > { %v867_v38 = vadd.f32 %v836_v37, %v786_v36 }
 0x53e   : > { %883 = vst [vmem:[#allocation10 + $0x30] sm:$0xff] %v867_v38 }
 0x543   : > { %v838_v40 = vpop.f32.mrf.mxu1 }
 0x544   : > { %v868_v41 = vadd.f32 %v838_v40, %v787_v39 }
 0x546   : > { %884 = vst [vmem:[#allocation10 + $0x38] sm:$0xff] %v868_v41 }
 0x551   : > { %v841_v43 = vpop.f32.mrf.mxu2 }
 0x552   : > { %v869_v44 = vadd.f32 %v841_v43, %v788_v42 }
 0x554   : > { %885 = vst [vmem:[#allocation10 + $0x40] sm:$0xff] %v869_v44 }
 0x559   : > { %v843_v46 = vpop.f32.mrf.mxu2 }
 0x55a   : > { %v870_v48 = vadd.f32 %v843_v46, %v789_v45 }
 0x55c   : > { %886 = vst [vmem:[#allocation10 + $0x48] sm:$0xff] %v870_v48 }
 0x561   : > { %v846_v49 = vpop.f32.mrf.mxu2 }
 0x562   : > { %v871_v50 = vadd.f32 %v846_v49, %v790_v47 }
 0x564   : > { %887 = vst [vmem:[#allocation10 + $0x50] sm:$0xff] %v871_v50 }
 0x569   : > { %v848_v52 = vpop.f32.mrf.mxu2 }
 0x56a   : > { %v872_v53 = vadd.f32 %v848_v52, %v791_v51 }
 0x56c   : > { %888 = vst [vmem:[#allocation10 + $0x58] sm:$0xff] %v872_v53 }
 0x571   : > { %v851_v57 = vpop.f32.mrf.mxu3 }
 0x572   : > { %v873_v58 = vadd.f32 %v851_v57, %v792_v55 }
 0x574   : > { %889 = vst [vmem:[#allocation10 + $0x60] sm:$0xff] %v873_v58 }
 0x579   : > { %v853_v62 = vpop.f32.mrf.mxu3 }
 0x57a   : > { %v874_v1 = vadd.f32 %v853_v62, %v793_v59 }
 0x57c   : > { %890 = vst [vmem:[#allocation10 + $0x68] sm:$0xff] %v874_v1 }
 0x581   : > { %v856_v63 = vpop.f32.mrf.mxu3 }
 0x582   : > { %v875_v3 = vadd.f32 %v856_v63, %v794_v60 }
 0x584   : > { %891 = vst [vmem:[#allocation10 + $0x70] sm:$0xff] %v875_v3 }
 0x589   : > { %v858_v5 = vpop.f32.mrf.mxu3 }
 0x58a   : > { %v876_v8 = vadd.f32 %v858_v5, %v795_v4 }
 0x58c   : > { %892 = vst [vmem:[#allocation10 + $0x78] sm:$0xff] %v876_v8 }
 0x58d PF: > { %p893_p11 = por %p645_p9, %p641_p8 }
 0x58f   : > { %896 = sbr.rel (%p893_p11) target bundleno = 1878 (0x756), region = 60 }
 0x594   : > { %v897_v7 = vlaneseq  ;;  %v2394_v10 = vstv %s2181_s27  ;;  %v2399_v13 = vstv %s2188_s8  ;;  %v2402_v15 = vstv %s2183_s28 }
 0x596   : > { %v2396_v11 = vshrl.u32 %v897_v7, 7 }
 0x598   : > { %v899_v16 = vadd.s32 8, %v2396_v11  ;;  %v2407_v18 = vadd.s32 %v2394_v10, %v2396_v11  ;;  %v900_v30 = vadd.s32 16, %v2396_v11  ;;  %v901_v31 = vadd.s32 24, %v2396_v11 }
 0x599   : > { %v902_v42 = vadd.s32 32, %v2396_v11  ;;  %v903_v43 = vadd.s32 40, %v2396_v11  ;;  %v904_v52 = vadd.s32 48, %v2396_v11  ;;  %v905_v53 = vadd.s32 56, %v2396_v11 }
 0x59a   : > { %v2410_v19 = vadd.s32 %v2394_v10, %v899_v16  ;;  %vm2786_vm0 = vcmp.lt.s32.totalorder %v2407_v18, %v2399_v13  ;;  %vm2782_vm1 = vcmp.lt.s32.totalorder %v2407_v18, %v2402_v15  ;;  %v2439_v34 = vadd.s32 %v2394_v10, %v900_v30 }
 0x59b   : > { %v980_v21 = vsel %vm2786_vm0, %v2307_v56, 0.0  ;;  %v1053_v22 = vsel %vm2782_vm1, %v2307_v56, 0.0  ;;  %v2442_v35 = vadd.s32 %v2394_v10, %v901_v31  ;;  %v2471_v44 = vadd.s32 %v2394_v10, %v902_v42 }
 0x59c   : > { %vm2785_vm2 = vcmp.lt.s32.totalorder %v2410_v19, %v2399_v13  ;;  %vm2781_vm3 = vcmp.lt.s32.totalorder %v2410_v19, %v2402_v15  ;;  %vm2788_vm4 = vcmp.lt.s32.totalorder %v2439_v34, %v2399_v13  ;;  %vm2784_vm6 = vcmp.lt.s32.totalorder %v2439_v34, %v2402_v15 }
 0x59d   : > { %v981_v23 = vsel %vm2785_vm2, %v2319_v6, 0.0  ;;  %v1054_v25 = vsel %vm2781_vm3, %v2319_v6, 0.0  ;;  %vm2787_vm5 = vcmp.lt.s32.totalorder %v2442_v35, %v2399_v13  ;;  %vm2783_vm7 = vcmp.lt.s32.totalorder %v2442_v35, %v2402_v15 }
 0x59e   : > { %v996_v26 = vpack.c.bf16 %v981_v23, %v980_v21  ;;  %v1069_v28 = vpack.c.bf16 %v1054_v25, %v1053_v22  ;;  %v982_v36 = vsel %vm2788_vm4, %v2322_v9, 0.0  ;;  %v983_v37 = vsel %vm2787_vm5, %v2340_v27, 0.0 }
 0x59f   : > { %v1055_v38 = vsel %vm2784_vm6, %v2322_v9, 0.0  ;;  %v1056_v39 = vsel %vm2783_vm7, %v2340_v27, 0.0  ;;  %v997_v40 = vpack.c.bf16 %v983_v37, %v982_v36  ;;  %v2474_v45 = vadd.s32 %v2394_v10, %v903_v43 }
 0x5a0   : > { %1824 = vxpose.binary.xlu0.c.b16.start [1/16] %v1069_v28, %v996_v26, 128  ;;  %v1070_v41 = vpack.c.bf16 %v1056_v39, %v1055_v38  ;;  %vm2792_vm8 = vcmp.lt.s32.totalorder %v2471_v44, %v2399_v13  ;;  %vm2790_vm10 = vcmp.lt.s32.totalorder %v2471_v44, %v2402_v15  ;;  %v906_v3 = vadd.s32 64, %v2396_v11 }
 0x5a1   : > { %vm2791_vm9 = vcmp.lt.s32.totalorder %v2474_v45, %v2399_v13  ;;  %vm2789_vm11 = vcmp.lt.s32.totalorder %v2474_v45, %v2402_v15  ;;  %v984_v46 = vsel %vm2792_vm8, %v2304_v54, 0.0  ;;  %v1057_v47 = vsel %vm2790_vm10, %v2304_v54, 0.0 }
 0x5a2   : > { %v985_v48 = vsel %vm2791_vm9, %v2316_v2, 0.0  ;;  %v1058_v49 = vsel %vm2789_vm11, %v2316_v2, 0.0  ;;  %v2503_v55 = vadd.s32 %v2394_v10, %v904_v52  ;;  %v2506_v57 = vadd.s32 %v2394_v10, %v905_v53 }
 0x5a3   : > { %v998_v50 = vpack.c.bf16 %v985_v48, %v984_v46  ;;  %v1071_v51 = vpack.c.bf16 %v1058_v49, %v1057_v47  ;;  %v907_v4 = vadd.s32 72, %v2396_v11  ;;  %v2535_v5 = vadd.s32 %v2394_v10, %v906_v3 }
 0x5a4   : > { %vm2796_vm12 = vcmp.lt.s32.totalorder %v2503_v55, %v2399_v13  ;;  %vm2795_vm13 = vcmp.lt.s32.totalorder %v2506_v57, %v2399_v13  ;;  %vm2794_vm14 = vcmp.lt.s32.totalorder %v2503_v55, %v2402_v15  ;;  %vm2793_vm15 = vcmp.lt.s32.totalorder %v2506_v57, %v2402_v15 }
 0x5a5   : > { %v986_v58 = vsel %vm2796_vm12, %v2334_v20, 0.0  ;;  %v987_v59 = vsel %vm2795_vm13, %v2337_v24, 0.0  ;;  %v1059_v62 = vsel %vm2794_vm14, %v2334_v20, 0.0  ;;  %v1060_v1 = vsel %vm2793_vm15, %v2337_v24, 0.0 }
 0x5a6   : > { %v999_v60 = vpack.c.bf16 %v987_v59, %v986_v58  ;;  %v1072_v63 = vpack.c.bf16 %v1060_v1, %v1059_v62  ;;  %v2538_v8 = vadd.s32 %v2394_v10, %v907_v4  ;;  %vm940_vm3 = vcmp.lt.s32.totalorder %v2535_v5, %v2399_v13  ;;  %v1207_v4 = vld [vmem:[#allocation9] sm:$0xff] }
 0x5a7   : > { %vm2800_vm7 = vcmp.lt.s32.totalorder %v2535_v5, %v2402_v15  ;;  %v988_v7 = vsel %vm940_vm3, %v2310_v61, 0.0  ;;  %v908_v26 = vadd.s32 80, %v2396_v11  ;;  %v909_v28 = vadd.s32 88, %v2396_v11 }
 0x5a8   : > { %vm941_vm1 = vcmp.lt.s32.totalorder %v2538_v8, %v2399_v13  ;;  %vm2799_vm6 = vcmp.lt.s32.totalorder %v2538_v8, %v2402_v15  ;;  %v1061_v21 = vsel %vm2800_vm7, %v2310_v61, 0.0  ;;  %v912_v36 = vadd.s32 112, %v2396_v11 }
 0x5a9   : > { %v989_v16 = vsel %vm941_vm1, %v2325_v12, 0.0  ;;  %v1062_v22 = vsel %vm2799_vm6, %v2325_v12, 0.0  ;;  %v925_v30 = vadd.s32 %v2394_v10, %v908_v26  ;;  %v926_v31 = vadd.s32 %v2394_v10, %v909_v28  ;;  %v1256_v28 = vld [vmem:[#allocation10 + $0x8] sm:$0xff] }
 0x5aa   : > { %v1000_v23 = vpack.c.bf16 %v989_v16, %v988_v7  ;;  %v1073_v25 = vpack.c.bf16 %v1062_v22, %v1061_v21  ;;  %v913_v37 = vadd.s32 120, %v2396_v11  ;;  %v910_v42 = vadd.s32 96, %v2396_v11  ;;  %v1255_v7 = vld [vmem:[#allocation10] sm:$0xff] }
 0x5ab   : > { %vm942_vm2 = vcmp.lt.s32.totalorder %v925_v30, %v2399_v13  ;;  %vm943_vm0 = vcmp.lt.s32.totalorder %v926_v31, %v2399_v13  ;;  %vm1015_vm5 = vcmp.lt.s32.totalorder %v925_v30, %v2402_v15  ;;  %vm1016_vm4 = vcmp.lt.s32.totalorder %v926_v31, %v2402_v15 }
 0x5ac   : > { %v990_v38 = vsel %vm942_vm2, %v2328_v14, 0.0  ;;  %v991_v39 = vsel %vm943_vm0, %v2331_v17, 0.0  ;;  %v911_v43 = vadd.s32 104, %v2396_v11  ;;  %v2589_v46 = vadd.s32 %v2394_v10, %v912_v36 }
 0x5ad   : > { %v2592_v48 = vadd.s32 %v2394_v10, %v913_v37  ;;  %v1001_v47 = vpack.c.bf16 %v991_v39, %v990_v38  ;;  %v1515_v11 = vpack.c.bf16 %v2349_v33, %v2343_v29  ;;  %v1521_v52 = vpack.c.bf16 %v2331_v17, %v2328_v14  ;;  %v1209_v37 = vld [vmem:[#allocation9 + $0x10] sm:$0xff] }
 0x5ae   : > { %vm2798_vm11 = vcmp.lt.s32.totalorder %v2589_v46, %v2399_v13  ;;  %vm1019_vm14 = vcmp.lt.s32.totalorder %v2589_v46, %v2402_v15 }
 0x5af   : > { %vm2797_vm10 = vcmp.lt.s32.totalorder %v2592_v48, %v2399_v13  ;;  %vm1020_vm13 = vcmp.lt.s32.totalorder %v2592_v48, %v2402_v15 }
 0x5b0   : > { %1825 = vxpose.binary.xlu0.c.b16.cont [2/16] %v1070_v41, %v997_v40, 128  ;;  %v1063_v40 = vsel %vm1015_vm5, %v2328_v14, 0.0  ;;  %v1064_v41 = vsel %vm1016_vm4, %v2331_v17, 0.0  ;;  %vm1514_vm9 = vmpackc.low %vm2797_vm10, %vm2798_vm11  ;;  %v1524_v17 = vpack.c.bf16 %v2325_v12, %v2310_v61  ;;  %v1530_v61 = vpack.c.bf16 %v2316_v2, %v2304_v54 }
 0x5b1   : > { %v1074_v49 = vpack.c.bf16 %v1064_v41, %v1063_v40  ;;  %1516 = vmatpush.bf16.msk.msra.mxu0 %vm1514_vm9, %v1515_v11  ;;  %1657 = vmatpush.bf16.msk.msra.mxu2 %vm1514_vm9, %v1515_v11  ;;  %vm1538_vm10 = vmpackc.low %vm1020_vm13, %vm1019_vm14  ;;  %v1533_v54 = vpack.c.bf16 %v2340_v27, %v2322_v9  ;;  %v1067_v12 = vsel %vm1019_vm14, %v2343_v29, 0.0  ;;  %vm2822_vm14 = vcmp.lt.s32.totalorder %v2442_v35, %v2402_v15  ;;  %v1257_v40 = vld [vmem:[#allocation10 + $0x10] sm:$0xff] }
 0x5b2   : > { %1540 = vmatpush.bf16.msk.msra.mxu1 %vm1538_vm10, %v1515_v11  ;;  %1665 = vmatpush.bf16.msk.msra.mxu3 %vm1538_vm10, %v1515_v11  ;;  %vm1520_vm9 = vmpackc.low %vm943_vm0, %vm942_vm2  ;;  %vm2805_vm2 = vcmp.lt.s32.totalorder %v2535_v5, %v2402_v15 }
 0x5b3   : > { %vm1544_vm10 = vmpackc.low %vm1016_vm4, %vm1015_vm5  ;;  %vm2806_vm4 = vcmp.lt.s32.totalorder %v2538_v8, %v2402_v15 }
 0x5b4   : > { %vm1523_vm0 = vmpackc.low %vm941_vm1, %vm940_vm3  ;;  %vm2808_vm1 = vcmp.lt.s32.totalorder %v2506_v57, %v2399_v13 }
 0x5b5   : > { %vm1547_vm5 = vmpackc.low %vm2806_vm4, %vm2805_vm2  ;;  %vm2815_vm4 = vcmp.lt.s32.totalorder %v2439_v34, %v2399_v13 }
 0x5c0   : > { %1826 = vxpose.binary.xlu0.c.b16.cont [3/16] %v1071_v51, %v998_v50, 128  ;;  %v927_v50 = vadd.s32 %v2394_v10, %v910_v42  ;;  %v928_v51 = vadd.s32 %v2394_v10, %v911_v43  ;;  %v1518_v10 = vpack.c.bf16 %v2346_v32, %v2313_v0 }
 0x5c2   : > { %vm944_vm8 = vcmp.lt.s32.totalorder %v927_v50, %v2399_v13  ;;  %vm945_vm15 = vcmp.lt.s32.totalorder %v928_v51, %v2399_v13  ;;  %vm1017_vm11 = vcmp.lt.s32.totalorder %v927_v50, %v2402_v15  ;;  %vm1018_vm6 = vcmp.lt.s32.totalorder %v928_v51, %v2402_v15 }
 0x5c3   : > { %vm1517_vm12 = vmpackc.low %vm945_vm15, %vm944_vm8  ;;  %v992_v53 = vsel %vm944_vm8, %v2313_v0, 0.0  ;;  %v993_v58 = vsel %vm945_vm15, %v2346_v32, 0.0  ;;  %v1065_v59 = vsel %vm1017_vm11, %v2313_v0, 0.0  ;;  %v1066_v14 = vsel %vm1018_vm6, %v2346_v32, 0.0 }
 0x5c4   : > { %vm1541_vm7 = vmpackc.low %vm1018_vm6, %vm1017_vm11  ;;  %1519 = vmatpush.bf16.msk.msra.mxu0 %vm1517_vm12, %v1518_v10  ;;  %1658 = vmatpush.bf16.msk.msra.mxu2 %vm1517_vm12, %v1518_v10  ;;  %v1002_v0 = vpack.c.bf16 %v993_v58, %v992_v53  ;;  %v1075_v62 = vpack.c.bf16 %v1066_v14, %v1065_v59  ;;  %v1527_v32 = vpack.c.bf16 %v2337_v24, %v2334_v20  ;;  %v1068_v20 = vsel %vm1020_vm13, %v2349_v33, 0.0  ;;  %v1259_v53 = vld [vmem:[#allocation10 + $0x20] sm:$0xff] }
 0x5c5   : > { %1543 = vmatpush.bf16.msk.msra.mxu1 %vm1541_vm7, %v1518_v10  ;;  %1666 = vmatpush.bf16.msk.msra.mxu3 %vm1541_vm7, %v1518_v10  ;;  %vm2807_vm6 = vcmp.lt.s32.totalorder %v2503_v55, %v2399_v13  ;;  %vm2809_vm7 = vcmp.lt.s32.totalorder %v2503_v55, %v2402_v15  ;;  %vm2810_vm8 = vcmp.lt.s32.totalorder %v2506_v57, %v2402_v15  ;;  %v1211_v10 = vld [vmem:[#allocation9 + $0x20] sm:$0xff] }
 0x5c6   : > { %vm1526_vm3 = vmpackc.low %vm2808_vm1, %vm2807_vm6  ;;  %vm2811_vm12 = vcmp.lt.s32.totalorder %v2471_v44, %v2399_v13  ;;  %vm2812_vm15 = vcmp.lt.s32.totalorder %v2474_v45, %v2399_v13  ;;  %vm2817_vm1 = vcmp.lt.s32.totalorder %v2589_v46, %v2399_v13  ;;  %v1536_v24 = vpack.c.bf16 %v2319_v6, %v2307_v56  ;;  %v1210_v46 = vld [vmem:[#allocation9 + $0x18] sm:$0xff] }
 0x5c7   : > { %vm1550_vm11 = vmpackc.low %vm2810_vm8, %vm2809_vm7  ;;  %v994_v2 = vsel %vm2817_vm1, %v2343_v29, 0.0  ;;  %vm2819_vm7 = vcmp.lt.s32.totalorder %v2407_v18, %v2399_v13  ;;  %vm2820_vm8 = vcmp.lt.s32.totalorder %v2410_v19, %v2399_v13  ;;  %v1076_v29 = vpack.c.bf16 %v1068_v20, %v1067_v12  ;;  %v1213_v12 = vld [vmem:[#allocation9 + $0x30] sm:$0xff] }
 0x5c8   : > { %1522 = vmatpush.bf16.msk.msra.mxu0 %vm1520_vm9, %v1521_v52  ;;  %1659 = vmatpush.bf16.msk.msra.mxu2 %vm1520_vm9, %v1521_v52  ;;  %vm1529_vm9 = vmpackc.low %vm2812_vm15, %vm2811_vm12  ;;  %vm2821_vm13 = vcmp.lt.s32.totalorder %v2439_v34, %v2402_v15  ;;  %vm2823_vm15 = vcmp.lt.s32.totalorder %v2407_v18, %v2402_v15 }
 0x5c9   : > { %1546 = vmatpush.bf16.msk.msra.mxu1 %vm1544_vm10, %v1521_v52  ;;  %1667 = vmatpush.bf16.msk.msra.mxu3 %vm1544_vm10, %v1521_v52  ;;  %vm2813_vm10 = vcmp.lt.s32.totalorder %v2471_v44, %v2402_v15  ;;  %vm1556_vm12 = vmpackc.low %vm2822_vm14, %vm2821_vm13 }
 0x5cc   : > { %1525 = vmatpush.bf16.msk.msra.mxu0 %vm1523_vm0, %v1524_v17  ;;  %1660 = vmatpush.bf16.msk.msra.mxu2 %vm1523_vm0, %v1524_v17  ;;  %vm2814_vm0 = vcmp.lt.s32.totalorder %v2474_v45, %v2402_v15 }
 0x5cd   : > { %1549 = vmatpush.bf16.msk.msra.mxu1 %vm1547_vm5, %v1524_v17  ;;  %1668 = vmatpush.bf16.msk.msra.mxu3 %vm1547_vm5, %v1524_v17  ;;  %vm1553_vm2 = vmpackc.low %vm2814_vm0, %vm2813_vm10  ;;  %vm2816_vm5 = vcmp.lt.s32.totalorder %v2442_v35, %v2399_v13 }
 0x5ce   : > { %vm1532_vm6 = vmpackc.low %vm2816_vm5, %vm2815_vm4 }
 0x5d0   : > { %1827 = vxpose.binary.xlu0.c.b16.cont [4/16] %v1072_v63, %v999_v60, 128 }
 0x5d1   : > { %1528 = vmatpush.bf16.msk.msra.mxu0 %vm1526_vm3, %v1527_v32  ;;  %1661 = vmatpush.bf16.msk.msra.mxu2 %vm1526_vm3, %v1527_v32  ;;  %vm2818_vm3 = vcmp.lt.s32.totalorder %v2592_v48, %v2399_v13 }
 0x5d2   : > { %1552 = vmatpush.bf16.msk.msra.mxu1 %vm1550_vm11, %v1527_v32  ;;  %1669 = vmatpush.bf16.msk.msra.mxu3 %vm1550_vm11, %v1527_v32  ;;  %v995_v9 = vsel %vm2818_vm3, %v2349_v33, 0.0  ;;  %vm1535_vm11 = vmpackc.low %vm2820_vm8, %vm2819_vm7  ;;  %v1260_v32 = vld [vmem:[#allocation10 + $0x28] sm:$0xff] }
 0x5d3   : > { %v1003_v27 = vpack.c.bf16 %v995_v9, %v994_v2 }
 0x5d5   : > { %1531 = vmatpush.bf16.msk.msra.mxu0 %vm1529_vm9, %v1530_v61  ;;  %1662 = vmatpush.bf16.msk.msra.mxu2 %vm1529_vm9, %v1530_v61  ;;  %vm2824_vm9 = vcmp.lt.s32.totalorder %v2410_v19, %v2402_v15 }
 0x5d6   : > { %1555 = vmatpush.bf16.msk.msra.mxu1 %vm1553_vm2, %v1530_v61  ;;  %1670 = vmatpush.bf16.msk.msra.mxu3 %vm1553_vm2, %v1530_v61  ;;  %vm1559_vm10 = vmpackc.low %vm2824_vm9, %vm2823_vm15 }
 0x5d9   : > { %1534 = vmatpush.bf16.msk.msra.mxu0 %vm1532_vm6, %v1533_v54  ;;  %1663 = vmatpush.bf16.msk.msra.mxu2 %vm1532_vm6, %v1533_v54 }
 0x5da   : > { %1558 = vmatpush.bf16.msk.msra.mxu1 %vm1556_vm12, %v1533_v54  ;;  %1671 = vmatpush.bf16.msk.msra.mxu3 %vm1556_vm12, %v1533_v54 }
 0x5dd   : > { %1537 = vmatpush.bf16.msk.msra.mxu0 %vm1535_vm11, %v1536_v24  ;;  %1664 = vmatpush.bf16.msk.msra.mxu2 %vm1535_vm11, %v1536_v24 }
 0x5de   : > { %1561 = vmatpush.bf16.msk.msra.mxu1 %vm1559_vm10, %v1536_v24  ;;  %1672 = vmatpush.bf16.msk.msra.mxu3 %vm1559_vm10, %v1536_v24  ;;  %v1261_v24 = vld [vmem:[#allocation10 + $0x30] sm:$0xff] }
 0x5e0   : > { %1828 = vxpose.binary.xlu0.c.b16.cont [5/16] %v1073_v25, %v1000_v23, 128  ;;  %v1208_v23 = vld [vmem:[#allocation9 + $0x8] sm:$0xff] }
 0x5f0   : > { %1829 = vxpose.binary.xlu0.c.b16.cont [6/16] %v1074_v49, %v1001_v47, 128  ;;  %v1258_v47 = vld [vmem:[#allocation10 + $0x18] sm:$0xff] }
 0x600   : > { %1830 = vxpose.binary.xlu0.c.b16.cont [7/16] %v1075_v62, %v1002_v0, 128  ;;  %v1212_v0 = vld [vmem:[#allocation9 + $0x28] sm:$0xff] }
 0x610   : > { %1831 = vxpose.binary.xlu0.c.b16.end [8/16] %v1076_v29, %v1003_v27, 128 }
 0x64c   : > { %v1832_v56 = vpop.trf.xlu0 }
 0x64d   : > { %1101 = vmatmul.bf16.vlgmr.msra.gmra.mxu0 %v1832_v56 }
 0x654   : > { %v1833_v6 = vpop.trf.xlu0 }
 0x655   : > { %1166 = vmatmul.bf16.vlgmr.msra.gmra.mxu1 %v1833_v6  ;;  %v1214_v6 = vld [vmem:[#allocation9 + $0x38] sm:$0xff] }
 0x65c   : > { %v1834_v33 = vpop.trf.xlu0 }
 0x65d   : > { %1106 = vmatmul.bf16.gmra.mxu0 %v1834_v33 }
 0x664   : > { %v1835_v13 = vpop.trf.xlu0 }
 0x665   : > { %1171 = vmatmul.bf16.gmra.mxu1 %v1835_v13 }
 0x66c   : > { %v1836_v34 = vpop.trf.xlu0 }
 0x66d   : > { %1111 = vmatmul.bf16.gmra.mxu0 %v1836_v34  ;;  %v1262_v34 = vld [vmem:[#allocation10 + $0x38] sm:$0xff] }
 0x674   : > { %v1837_v35 = vpop.trf.xlu0 }
 0x675   : > { %1176 = vmatmul.bf16.gmra.mxu1 %v1837_v35 }
 0x67c   : > { %v1838_v44 = vpop.trf.xlu0 }
 0x67d   : > { %1116 = vmatmul.bf16.gmra.mxu0 %v1838_v44 }
 0x684   : > { %v1839_v18 = vpop.trf.xlu0 }
 0x685   : > { %1181 = vmatmul.bf16.gmra.mxu1 %v1839_v18 }
 0x68c   : > { %v1840_v15 = vpop.trf.xlu0 }
 0x68d   : > { %1121 = vmatmul.bf16.vlgmr.msra.gmra.mxu2 %v1840_v15 }
 0x694   : > { %v1841_v19 = vpop.trf.xlu0 }
 0x695   : > { %1186 = vmatmul.bf16.vlgmr.msra.gmra.mxu3 %v1841_v19  ;;  %v1215_v19 = vld [vmem:[#allocation9 + $0x40] sm:$0xff] }
 0x69c   : > { %v1842_v45 = vpop.trf.xlu0 }
 0x69d   : > { %1126 = vmatmul.bf16.gmra.mxu2 %v1842_v45 }
 0x6a4   : > { %v1843_v55 = vpop.trf.xlu0 }
 0x6a5   : > { %1191 = vmatmul.bf16.gmra.mxu3 %v1843_v55 }
 0x6ac   : > { %v1844_v57 = vpop.trf.xlu0 }
 0x6ad   : > { %1131 = vmatmul.bf16.gmra.mxu2 %v1844_v57  ;;  %v1263_v57 = vld [vmem:[#allocation10 + $0x40] sm:$0xff] }
 0x6b4   : > { %v1845_v1 = vpop.trf.xlu0 }
 0x6b5   : > { %1196 = vmatmul.bf16.gmra.mxu3 %v1845_v1 }
 0x6bc   : > { %v1846_v60 = vpop.trf.xlu0 }
 0x6bd   : > { %1136 = vmatmul.bf16.gmra.mxu2 %v1846_v60 }
 0x6c4   : > { %v1847_v63 = vpop.trf.xlu0 }
 0x6c5   : > { %1201 = vmatmul.bf16.gmra.mxu3 %v1847_v63 }
 0x6ca   : > { %v1102_v3 = vpop.f32.mrf.mxu0 }
 0x6d2   : > { %v1104_v5 = vpop.f32.mrf.mxu0  ;;  %v1167_v8 = vpop.f32.mrf.mxu1 }
 0x6d3   : > { %v1223_v16 = vadd.f32 %v1207_v4, %v1167_v8  ;;  %v1271_v21 = vsub.f32 %v1102_v3, %v1167_v8  ;;  %v1216_v3 = vld [vmem:[#allocation9 + $0x48] sm:$0xff] }
 0x6d4   : > { %v1264_v8 = vld [vmem:[#allocation10 + $0x48] sm:$0xff] }
 0x6d5   : > { %1239 = vst [vmem:[#allocation9] sm:$0xff] %v1223_v16  ;;  %v1287_v22 = vadd.f32 %v1271_v21, %v1255_v7 }
 0x6d7   : > { %1303 = vst [vmem:[#allocation10] sm:$0xff] %v1287_v22  ;;  %v1217_v22 = vld [vmem:[#allocation9 + $0x50] sm:$0xff] }
 0x6da   : > { %v1107_v25 = vpop.f32.mrf.mxu0  ;;  %v1169_v26 = vpop.f32.mrf.mxu1 }
 0x6db   : > { %v1224_v30 = vadd.f32 %v1208_v23, %v1169_v26  ;;  %v1272_v31 = vsub.f32 %v1104_v5, %v1169_v26  ;;  %v1265_v26 = vld [vmem:[#allocation10 + $0x50] sm:$0xff] }
 0x6dd   : > { %1240 = vst [vmem:[#allocation9 + $0x8] sm:$0xff] %v1224_v30  ;;  %v1288_v36 = vadd.f32 %v1272_v31, %v1256_v28 }
 0x6df   : > { %1304 = vst [vmem:[#allocation10 + $0x8] sm:$0xff] %v1288_v36  ;;  %v1218_v36 = vld [vmem:[#allocation9 + $0x58] sm:$0xff] }
 0x6e2   : > { %v1109_v38 = vpop.f32.mrf.mxu0  ;;  %v1172_v39 = vpop.f32.mrf.mxu1 }
 0x6e3   : > { %v1225_v41 = vadd.f32 %v1209_v37, %v1172_v39  ;;  %v1273_v42 = vsub.f32 %v1107_v25, %v1172_v39 }
 0x6e5   : > { %1241 = vst [vmem:[#allocation9 + $0x10] sm:$0xff] %v1225_v41  ;;  %v1289_v43 = vadd.f32 %v1273_v42, %v1257_v40 }
 0x6e7   : > { %1305 = vst [vmem:[#allocation10 + $0x10] sm:$0xff] %v1289_v43  ;;  %v1219_v43 = vld [vmem:[#allocation9 + $0x60] sm:$0xff] }
 0x6ea   : > { %v1174_v48 = vpop.f32.mrf.mxu1  ;;  %v1112_v51 = vpop.f32.mrf.mxu0 }
 0x6eb   : > { %v1226_v49 = vadd.f32 %v1210_v46, %v1174_v48  ;;  %v1274_v50 = vsub.f32 %v1109_v38, %v1174_v48  ;;  %v1266_v38 = vld [vmem:[#allocation10 + $0x58] sm:$0xff]  ;;  %v1267_v48 = vld [vmem:[#allocation10 + $0x60] sm:$0xff] }
 0x6ed   : > { %1242 = vst [vmem:[#allocation9 + $0x18] sm:$0xff] %v1226_v49  ;;  %v1290_v11 = vadd.f32 %v1274_v50, %v1258_v47 }
 0x6ef   : > { %1306 = vst [vmem:[#allocation10 + $0x18] sm:$0xff] %v1290_v11  ;;  %v1220_v11 = vld [vmem:[#allocation9 + $0x68] sm:$0xff] }
 0x6f2   : > { %v1177_v52 = vpop.f32.mrf.mxu1  ;;  %v1114_v17 = vpop.f32.mrf.mxu0 }
 0x6f3   : > { %v1227_v58 = vadd.f32 %v1211_v10, %v1177_v52  ;;  %v1275_v59 = vsub.f32 %v1112_v51, %v1177_v52  ;;  %v1268_v52 = vld [vmem:[#allocation10 + $0x68] sm:$0xff] }
 0x6f5   : > { %1243 = vst [vmem:[#allocation9 + $0x20] sm:$0xff] %v1227_v58  ;;  %v1291_v14 = vadd.f32 %v1275_v59, %v1259_v53 }
 0x6f7   : > { %1307 = vst [vmem:[#allocation10 + $0x20] sm:$0xff] %v1291_v14 }
 0x6fa   : > { %v1179_v62 = vpop.f32.mrf.mxu1  ;;  %v1117_v9 = vpop.f32.mrf.mxu0 }
 0x6fb   : > { %v1228_v61 = vadd.f32 %v1212_v0, %v1179_v62  ;;  %v1276_v54 = vsub.f32 %v1114_v17, %v1179_v62  ;;  %v1221_v17 = vld [vmem:[#allocation9 + $0x70] sm:$0xff] }
 0x6fc   : > { %v1269_v62 = vld [vmem:[#allocation10 + $0x70] sm:$0xff] }
 0x6fd   : > { %1244 = vst [vmem:[#allocation9 + $0x28] sm:$0xff] %v1228_v61  ;;  %v1292_v2 = vadd.f32 %v1276_v54, %v1260_v32 }
 0x6ff   : > { %1308 = vst [vmem:[#allocation10 + $0x28] sm:$0xff] %v1292_v2  ;;  %v1222_v2 = vld [vmem:[#allocation9 + $0x78] sm:$0xff] }
 0x702   : > { %v1182_v20 = vpop.f32.mrf.mxu1  ;;  %v1119_v33 = vpop.f32.mrf.mxu0 }
 0x703   : > { %v1229_v27 = vadd.f32 %v1213_v12, %v1182_v20  ;;  %v1277_v29 = vsub.f32 %v1117_v9, %v1182_v20  ;;  %v1270_v20 = vld [vmem:[#allocation10 + $0x78] sm:$0xff] }
 0x705   : > { %1245 = vst [vmem:[#allocation9 + $0x30] sm:$0xff] %v1229_v27  ;;  %v1293_v56 = vadd.f32 %v1277_v29, %v1261_v24 }
 0x707   : > { %1309 = vst [vmem:[#allocation10 + $0x30] sm:$0xff] %v1293_v56 }
 0x70a   : > { %v1184_v13 = vpop.f32.mrf.mxu1 }
 0x70b   : > { %v1230_v35 = vadd.f32 %v1214_v6, %v1184_v13  ;;  %v1278_v44 = vsub.f32 %v1119_v33, %v1184_v13 }
 0x70d   : > { %1246 = vst [vmem:[#allocation9 + $0x38] sm:$0xff] %v1230_v35  ;;  %v1294_v18 = vadd.f32 %v1278_v44, %v1262_v34 }
 0x70f   : > { %1310 = vst [vmem:[#allocation10 + $0x38] sm:$0xff] %v1294_v18 }
 0x710   : > { %v1122_v15 = vpop.f32.mrf.mxu2 }
 0x718   : > { %v1124_v45 = vpop.f32.mrf.mxu2  ;;  %v1187_v55 = vpop.f32.mrf.mxu3 }
 0x719   : > { %v1231_v1 = vadd.f32 %v1215_v19, %v1187_v55  ;;  %v1279_v60 = vsub.f32 %v1122_v15, %v1187_v55 }
 0x71b   : > { %1247 = vst [vmem:[#allocation9 + $0x40] sm:$0xff] %v1231_v1  ;;  %v1295_v63 = vadd.f32 %v1279_v60, %v1263_v57 }
 0x71d   : > { %1311 = vst [vmem:[#allocation10 + $0x40] sm:$0xff] %v1295_v63 }
 0x720   : > { %v1127_v4 = vpop.f32.mrf.mxu2  ;;  %v1189_v5 = vpop.f32.mrf.mxu3 }
 0x721   : > { %v1232_v7 = vadd.f32 %v1216_v3, %v1189_v5  ;;  %v1280_v16 = vsub.f32 %v1124_v45, %v1189_v5 }
 0x723   : > { %1248 = vst [vmem:[#allocation9 + $0x48] sm:$0xff] %v1232_v7  ;;  %v1296_v21 = vadd.f32 %v1280_v16, %v1264_v8 }
 0x725   : > { %1312 = vst [vmem:[#allocation10 + $0x48] sm:$0xff] %v1296_v21 }
 0x728   : > { %v1129_v23 = vpop.f32.mrf.mxu2  ;;  %v1192_v25 = vpop.f32.mrf.mxu3 }
 0x729   : > { %v1233_v28 = vadd.f32 %v1217_v22, %v1192_v25  ;;  %v1281_v30 = vsub.f32 %v1127_v4, %v1192_v25 }
 0x72b   : > { %1249 = vst [vmem:[#allocation9 + $0x50] sm:$0xff] %v1233_v28  ;;  %v1297_v31 = vadd.f32 %v1281_v30, %v1265_v26 }
 0x72d   : > { %1313 = vst [vmem:[#allocation10 + $0x50] sm:$0xff] %v1297_v31 }
 0x730   : > { %v1194_v37 = vpop.f32.mrf.mxu3  ;;  %v1132_v41 = vpop.f32.mrf.mxu2 }
 0x731   : > { %v1234_v39 = vadd.f32 %v1218_v36, %v1194_v37  ;;  %v1282_v40 = vsub.f32 %v1129_v23, %v1194_v37 }
 0x733   : > { %1250 = vst [vmem:[#allocation9 + $0x58] sm:$0xff] %v1234_v39  ;;  %v1298_v42 = vadd.f32 %v1282_v40, %v1266_v38 }
 0x735   : > { %1314 = vst [vmem:[#allocation10 + $0x58] sm:$0xff] %v1298_v42 }
 0x738   : > { %v1197_v46 = vpop.f32.mrf.mxu3  ;;  %v1134_v51 = vpop.f32.mrf.mxu2 }
 0x739   : > { %v1235_v47 = vadd.f32 %v1219_v43, %v1197_v46  ;;  %v1283_v49 = vsub.f32 %v1132_v41, %v1197_v46 }
 0x73b   : > { %1251 = vst [vmem:[#allocation9 + $0x60] sm:$0xff] %v1235_v47  ;;  %v1299_v50 = vadd.f32 %v1283_v49, %v1267_v48 }
 0x73d   : > { %1315 = vst [vmem:[#allocation10 + $0x60] sm:$0xff] %v1299_v50 }
 0x740   : > { %v1199_v10 = vpop.f32.mrf.mxu3  ;;  %v1137_v14 = vpop.f32.mrf.mxu2 }
 0x741   : > { %v1236_v53 = vadd.f32 %v1220_v11, %v1199_v10  ;;  %v1284_v58 = vsub.f32 %v1134_v51, %v1199_v10 }
 0x743   : > { %1252 = vst [vmem:[#allocation9 + $0x68] sm:$0xff] %v1236_v53  ;;  %v1300_v59 = vadd.f32 %v1284_v58, %v1268_v52 }
 0x745   : > { %1316 = vst [vmem:[#allocation10 + $0x68] sm:$0xff] %v1300_v59 }
 0x748   : > { %v1202_v0 = vpop.f32.mrf.mxu3  ;;  %v1139_v9 = vpop.f32.mrf.mxu2 }
 0x749   : > { %v1237_v32 = vadd.f32 %v1221_v17, %v1202_v0  ;;  %v1285_v61 = vsub.f32 %v1137_v14, %v1202_v0 }
 0x74b   : > { %1253 = vst [vmem:[#allocation9 + $0x70] sm:$0xff] %v1237_v32  ;;  %v1301_v54 = vadd.f32 %v1285_v61, %v1269_v62 }
 0x74d   : > { %1317 = vst [vmem:[#allocation10 + $0x70] sm:$0xff] %v1301_v54 }
 0x750   : > { %v1204_v12 = vpop.f32.mrf.mxu3 }
 0x751   : > { %v1238_v24 = vadd.f32 %v1222_v2, %v1204_v12  ;;  %v1286_v27 = vsub.f32 %v1139_v9, %v1204_v12 }
 0x753   : > { %1254 = vst [vmem:[#allocation9 + $0x78] sm:$0xff] %v1238_v24  ;;  %v1302_v29 = vadd.f32 %v1286_v27, %v1270_v20 }
 0x755   : > { %1318 = vst [vmem:[#allocation10 + $0x78] sm:$0xff] %v1302_v29 }
 0x756 PF: > { %s2825_s16 = sadd.s32 4294967295, %s2040_s26   ;;  %s1329_s22 = sshll.u32 %s2778_s4, 4  ;;  %s1330_s22 = int_to_ptr.hbm [resolvable:$true] %s1329_s22 }
 0x757   : > { %p2734_p12 = scmp.eq.s32.totalorder %s2825_s16, 2  ;;  %s2047_s6 = smov [#allocation9]  }
 0x758   : > { %s1327_s7 = sshll.u32 %s2047_s6, 4  ;;  %s2048_s9 = smov 128   ;;  %s1328_s7 = int_to_ptr.vmem [resolvable:$true] %s1327_s7 }
 0x759   : > { %s2049_s10 = smov 8   ;;  %s2050_s14 = smov [#allocation10]  }
 0x75a   : > { %1680 = dma.vmem_to_hbm [thread:$0]  (%p2734_p12), %s1328_s7, 2048, %s1330_s22, [#allocation6], %s2048_s9, %s2048_s9, %s2049_s10  }
 0x75b   : > { %s1344_s15 = sshll.u32 %s2050_s14, 4  ;;  %s1346_s27 = sshll.u32 %s2779_s5, 4  ;;  %s1345_s15 = int_to_ptr.vmem [resolvable:$true] %s1344_s15  ;;  %s1347_s27 = int_to_ptr.hbm [resolvable:$true] %s1346_s27 }
 0x75c   : > { %1682 = dma.vmem_to_hbm [thread:$0]  (%p2734_p12), %s1345_s15, 2048, %s1347_s27, [#allocation11], %s2048_s9, %s2048_s9, %s2049_s10  }
 0x75d   : > { %2011 = dma.done.wait (%p2734_p12), [#allocation6], 2048  }
 0x75e   : > { %2013 = vsyncadd (%p2734_p12), [#allocation6], 4294965248 }
 0x75f   : > { %2015 = dma.done.wait (%p2734_p12), [#allocation11], 2048  }
 0x760   : > { %2017 = vsyncadd (%p2734_p12), [#allocation11], 4294965248 }
 0x761 PF: > { %s30_s26 = sadd.s32 1, %s2040_s26   ;;  %s2827_s22 = smov %s2024_s23 }
 0x762   : > { %p27_p13 = scmp.ge.s32.totalorder %s30_s26, 5   ;;  %s2828_s23 = smov %s2028_s24 }
 0x763   : > { %s2829_s24 = smov %s2156_s30  ;;  %s2830_s25 = smov %s2036_s0 }
 0x764   : > { %s2831_s0 = smov %s2833_s13  ;;  %29 = sbr.rel (!%p27_p13) target bundleno = 13 (0xd), region = 103 }
 0x769   :  { %1368 = vsyncpa [#allocation5], 1 }
 0x76a   :  { %1370 = vsyncpa [#allocation5 + $0x1], 1 }
 0x76b   :  { %1371 = vsyncpa [#allocation8], 1 }
 0x76c   :  { %1372 = vsyncpa [#allocation6], 1 }
 0x76d   :  { %1374 = vsyncpa [#allocation6 + $0x1], 1 }
 0x76e   :  { %1375 = vsyncpa [#allocation11], 1 }

</bundles_post_ra>
